<compile_context>
chip_gen: v7x
topology: tpu7x:2x2x1
jax: 0.10.0
libtpu: 0.0.40
codegen_flags: <defaults>
</compile_context>

<pallas_src>
import math
from functools import partial

import jax
import jax.numpy as jnp
from jax import lax
from jax.experimental import pallas as pl
from jax.experimental.pallas import tpu as pltpu


def _cdiv(a, b):
    return -(-a // b)


def _round_up(a, b):
    return _cdiv(a, b) * b


def _sinc_resample_kernel_weights(orig_freq, new_freq,
                                  lowpass_filter_width=6, rolloff=0.99):
    """Deterministic port of torchaudio._get_sinc_resample_kernel (hann window)."""
    gcd = math.gcd(int(orig_freq), int(new_freq))
    orig = int(orig_freq) // gcd
    new = int(new_freq) // gcd

    base_freq = min(orig, new) * rolloff
    width = int(math.ceil(lowpass_filter_width * orig / base_freq))

    idx = jnp.arange(-width, width + orig, dtype=jnp.float32) / orig        # (K,)
    t = jnp.arange(0, -new, -1, dtype=jnp.float32)[:, None] / new + idx[None, :]
    t = t * base_freq
    t = jnp.clip(t, -lowpass_filter_width, lowpass_filter_width)
    window = jnp.cos(t * math.pi / lowpass_filter_width / 2.0) ** 2
    t = t * math.pi
    scale = base_freq / orig
    weights = jnp.where(t == 0.0, jnp.float32(1.0), jnp.sin(t) / t)
    weights = (weights * window * scale).astype(jnp.float32)                # (new, K)
    return weights, width, orig, new


def _resample_kernel(w_ref, main_ref, halo_ref, out_ref, *, Kq, P):
    """One (row-block, frame-block) tile of the polyphase sinc resampler.

    w_ref:    (P8, K')          filter bank; K' = Kq*orig taps (zero padded past K)
    main_ref: (orig, blk, Fc)   polyphase window, frames on lanes (dense DMA)
    halo_ref: (orig, blk, HALO) first HALO polyphase frames of the next block
    out_ref:  (blk, P, Fc)      per-phase output, frames on lanes (no phase padding)
    """
    orig, blk, Fc = main_ref.shape
    p8, kp = w_ref.shape

    # Window including the tap overhang; every tap below is a contiguous lane slice.
    win = jnp.concatenate([main_ref[...], halo_ref[...]], axis=-1)       # (orig, blk, Fc+HALO)

    # im2col tile (blk, K', Fc) with tap order k' = q*orig + r (matches w_ref columns).
    if orig <= 8:
        # Small ratios: K' is small -> one lane-shifted (blk, Fc) slice per tap.
        taps = [win[k % orig, :, (k // orig):(k // orig) + Fc] for k in range(kp)]
        a = jnp.stack(taps, axis=1)                                      # (blk, K', Fc)
    else:
        # Large ratios: bound the static unroll at blk*Kq slices instead of Kq*orig.
        rows = []
        for b in range(blk):
            wb = win[:, b, :]                                            # (orig, Fc+HALO)
            rows.append(jnp.concatenate(
                [wb[:, q:q + Fc] for q in range(Kq)], axis=0))           # (K', Fc)
        a = jnp.stack(rows, axis=0)                                      # (blk, K', Fc)

    # One batched MXU contraction over the taps, f32 accumulation.
    w = jnp.broadcast_to(w_ref[...][None], (blk, p8, kp))
    res = jnp.einsum("bpk,bkf->bpf", w, a,
                     preferred_element_type=jnp.float32)                 # (blk, P8, Fc)
    out_ref[...] = res[:, :P, :].astype(out_ref.dtype)


def _tile_vmem_bytes(fc, halo, blk, orig, kp, p8, p, in_bytes, out_bytes):
    """Rough per-grid-step VMEM footprint (tiles incl. double buffering + scratch)."""
    b = 0
    b += orig * blk * fc * in_bytes * 2                 # main input tile
    b += orig * blk * halo * in_bytes * 2               # halo tile
    b += p8 * kp * in_bytes * 2                         # weight tile
    b += blk * _round_up(p, 8) * fc * out_bytes * 2     # output tile (sublane padded)
    b += orig * blk * (fc + halo) * in_bytes            # concatenated window
    b += 2 * blk * kp * fc * in_bytes                   # im2col (+ relayout copy)
    b += blk * p8 * kp * in_bytes                       # broadcast weights
    b += blk * p8 * fc * 4                              # f32 matmul result
    return b


def resample(x, source, target, *, compute_dtype=None,
             max_frames_per_block=4096, vmem_tile_budget_bytes=18 * 2**20):
    """Equivalent of torchaudio Resample(source, target)(x) for x of shape (..., time)."""
    source, target = int(source), int(target)
    if source == target:                      # torchaudio returns the input unchanged
        return x

    weights, width, orig, new = _sinc_resample_kernel_weights(source, target)
    P = new                                   # polyphase outputs per input frame
    K = weights.shape[1]                      # filter taps
    Kq = (K - 1) // orig + 1                  # taps per polyphase branch
    Kp = Kq * orig                            # tap count padded to a multiple of orig
    P8 = _round_up(P, 8)
    HALO = _round_up(max(Kq - 1, 1), 128)     # lane halo covering the tap overhang

    in_shape = x.shape
    length = in_shape[-1]
    xw = x.reshape(-1, length)
    NW = xw.shape[0]

    BLK = 8                                   # wav rows per block (input sublane dim)
    NW_pad = _round_up(NW, BLK)
    n_row_blocks = NW_pad // BLK

    # Valid frame count of torchaudio's strided conv over the padded waveform.
    F = (length + 2 * width + orig - K) // orig + 1

    cdt = jnp.dtype(compute_dtype) if compute_dtype is not None else jnp.dtype(x.dtype)
    in_bytes, out_bytes = cdt.itemsize, jnp.dtype(x.dtype).itemsize

    # ---- frame (time) blocking: bound VMEM, amortize per-grid-step overhead ----
    fc_cap = max(HALO, (max_frames_per_block // HALO) * HALO)
    Fc = min(_round_up(F, HALO), fc_cap)
    while Fc > HALO and _tile_vmem_bytes(Fc, HALO, BLK, orig, Kp, P8, P,
                                         in_bytes, out_bytes) > vmem_tile_budget_bytes:
        Fc -= HALO
    nFb = _cdiv(F, Fc)
    if n_row_blocks * nFb < 2 and F > HALO:   # keep >=2 parallel steps (v7x has 2 TCs)
        Fc = min(Fc, _round_up(_cdiv(F, 2), HALO))
        nFb = _cdiv(F, Fc)
    F_pad = nFb * Fc
    est = _tile_vmem_bytes(Fc, HALO, BLK, orig, Kp, P8, P, in_bytes, out_bytes)

    # ---- single fused pad + polyphase transpose: ph[r, b, q] = padded[b, q*orig + r] ----
    Qpad = max(F_pad + HALO, _cdiv(length + 2 * width + orig, orig))
    PLp = Qpad * orig
    padded = jnp.pad(xw, ((0, NW_pad - NW), (width, PLp - length - width)))
    ph = jnp.transpose(padded.reshape(NW_pad, Qpad, orig), (2, 0, 1))   # (orig, NW_pad, Qpad)
    ph = ph.astype(cdt)
    w_in = jnp.pad(weights, ((0, P8 - P), (0, Kp - K))).astype(cdt)     # (P8, Kp)

    halo_stride = Fc // HALO                  # Fc is always a multiple of HALO
    out = pl.pallas_call(
        partial(_resample_kernel, Kq=Kq, P=P),
        out_shape=jax.ShapeDtypeStruct((NW_pad, P, F_pad), x.dtype),
        grid=(n_row_blocks, nFb),
        in_specs=[
            pl.BlockSpec((P8, Kp), lambda i, j: (0, 0)),
            pl.BlockSpec((orig, BLK, Fc), lambda i, j: (0, i, j)),
            pl.BlockSpec((orig, BLK, HALO),
                         lambda i, j: (0, i, (j + 1) * halo_stride)),
        ],
        out_specs=pl.BlockSpec((BLK, P, Fc), lambda i, j: (i, 0, j)),
        compiler_params=pltpu.CompilerParams(
            dimension_semantics=("parallel", "parallel"),
            vmem_limit_bytes=int(min(64 * 2**20, max(32 * 2**20, 2 * est))),
        ),
    )(w_in, ph, ph)

    # Frame/phase interleave + crop: torchaudio's transpose->flatten->crop as ONE fused
    # XLA copy (the kernel output carries no phase zero-padding).
    # TODO(synk): fusing this interleave into the kernel store needs a stride-P lane
    # relayout of the result that Mosaic does not express cleanly today.
    target_length = int(math.ceil(new * length / orig))
    res = jnp.transpose(out[:NW], (0, 2, 1)).reshape(NW, F_pad * P)[:, :target_length]
    return res.reshape(in_shape[:-1] + (target_length,))


def resample_ref(x, source, target):
    """Pure-JAX reference matching the torchaudio algorithm (for validation)."""
    weights, width, orig, new = _sinc_resample_kernel_weights(source, target)
    in_shape = x.shape
    length = in_shape[-1]
    xw = x.reshape(-1, length)
    padded = jnp.pad(xw, ((0, 0), (width, width + orig)))
    conv = lax.conv_general_dilated(
        padded[:, None, :], weights[:, None, :],
        window_strides=(orig,), padding="VALID",
        dimension_numbers=("NCH", "OIH", "NCH"))          # (NW, new, F)
    NW = xw.shape[0]
    res = jnp.transpose(conv, (0, 2, 1)).reshape(NW, -1)
    target_length = int(math.ceil(new * length / orig))
    res = res[:, :target_length]
    return res.reshape(in_shape[:-1] + (target_length,))


if __name__ == "__main__":
    key = jax.random.PRNGKey(0)
    batch, channels, time = 2, 4, 64
    x = jax.random.normal(key, (batch, channels, time), dtype=jnp.float32)

    checks = []

    # 1) 2:3 upsample (8 kHz -> 12 kHz), f32 operands.
    #    Tolerance 2e-3 covers the MXU's default f32 matmul precision vs the XLA
    #    conv reference; real bugs would produce O(1) errors.
    y = resample(x, 8000, 12000)
    jax.block_until_ready(y)
    y_ref = resample_ref(x, 8000, 12000)
    assert y.shape == y_ref.shape == (batch, channels, 96), y.shape
    checks.append(bool(jnp.allclose(y, y_ref, atol=2e-3, rtol=2e-3)))

    # 2) 3:2 downsample (12 kHz -> 8 kHz), f32 operands.
    y2 = resample(x, 12000, 8000)
    jax.block_until_ready(y2)
    y2_ref = resample_ref(x, 12000, 8000)
    assert y2.shape == y2_ref.shape, (y2.shape, y2_ref.shape)
    checks.append(bool(jnp.allclose(y2, y2_ref, atol=2e-3, rtol=2e-3)))

    # 3) Longer clip: exercises the multi frame-block + halo path.
    x_long = jax.random.normal(jax.random.PRNGKey(1), (batch, channels, 2048),
                               dtype=jnp.float32)
    y3 = resample(x_long, 8000, 12000)
    jax.block_until_ready(y3)
    y3_ref = resample_ref(x_long, 8000, 12000)
    assert y3.shape == y3_ref.shape == (batch, channels, 3072), y3.shape
    checks.append(bool(jnp.allclose(y3, y3_ref, atol=2e-3, rtol=2e-3)))

    # 4) bf16 operands on the MXU (f32 accumulation), looser tolerance.
    y4 = resample(x, 8000, 12000, compute_dtype=jnp.bfloat16)
    jax.block_until_ready(y4)
    checks.append(bool(jnp.allclose(y4, y_ref, atol=5e-2, rtol=5e-2)))

    if not all(checks):
        raise AssertionError(f"Pallas resample mismatch vs JAX reference: {checks}")
    print("KERNEL_OK")
</pallas_src>

<mosaic_0001>
module attributes {stable_mosaic.version = 11 : i64} {
  func.func @_resample_kernel(%arg0: i32, %arg1: i32, %arg2: memref<8x16xf32, #tpu.memory_space<vmem>>, %arg3: memref<2x8x128xf32, #tpu.memory_space<vmem>>, %arg4: memref<2x8x128xf32, #tpu.memory_space<vmem>>, %arg5: memref<8x3x128xf32, #tpu.memory_space<vmem>>) attributes {dimension_semantics = [#tpu.dimension_semantics<parallel>, #tpu.dimension_semantics<parallel>], iteration_bounds = array<i64: 1, 1>, scalar_prefetch = 0 : i64, scratch_operands = 0 : i64, tpu.core_type = #tpu.core_type<tc>, window_params = [{pipeline_mode = #tpu.pipeline_mode<synchronous>, transform_indices = @transform_0, window_bounds = array<i64: 8, 16>}, {transform_indices = @transform_1, window_bounds = array<i64: 2, 8, 128>}, {transform_indices = @transform_2, window_bounds = array<i64: 2, 8, 128>}, {transform_indices = @transform_3, window_bounds = array<i64: 8, 3, 128>}]} {
    %c0 = arith.constant 0 : index
    %c0_0 = arith.constant 0 : index
    %c0_1 = arith.constant 0 : index
    %0 = vector.load %arg3[%c0, %c0_0, %c0_1] : memref<2x8x128xf32, #tpu.memory_space<vmem>>, vector<2x8x128xf32>
    %c0_2 = arith.constant 0 : index
    %c0_3 = arith.constant 0 : index
    %c0_4 = arith.constant 0 : index
    %1 = vector.load %arg4[%c0_2, %c0_3, %c0_4] : memref<2x8x128xf32, #tpu.memory_space<vmem>>, vector<2x8x128xf32>
    %2 = tpu.concatenate %0, %1 in 2 : vector<2x8x128xf32>, vector<2x8x128xf32> -> vector<2x8x256xf32>
    %3 = vector.extract_strided_slice %2 {offsets = [0, 0, 0], sizes = [1, 8, 128], strides = [1, 1, 1]} : vector<2x8x256xf32> to vector<1x8x128xf32>
    %4 = vector.shape_cast %3 : vector<1x8x128xf32> to vector<8x128xf32>
    %5 = vector.extract_strided_slice %2 {offsets = [1, 0, 0], sizes = [1, 8, 128], strides = [1, 1, 1]} : vector<2x8x256xf32> to vector<1x8x128xf32>
    %6 = vector.shape_cast %5 : vector<1x8x128xf32> to vector<8x128xf32>
    %7 = vector.extract_strided_slice %2 {offsets = [0, 0, 1], sizes = [1, 8, 128], strides = [1, 1, 1]} : vector<2x8x256xf32> to vector<1x8x128xf32>
    %8 = vector.shape_cast %7 : vector<1x8x128xf32> to vector<8x128xf32>
    %9 = vector.extract_strided_slice %2 {offsets = [1, 0, 1], sizes = [1, 8, 128], strides = [1, 1, 1]} : vector<2x8x256xf32> to vector<1x8x128xf32>
    %10 = vector.shape_cast %9 : vector<1x8x128xf32> to vector<8x128xf32>
    %11 = vector.extract_strided_slice %2 {offsets = [0, 0, 2], sizes = [1, 8, 128], strides = [1, 1, 1]} : vector<2x8x256xf32> to vector<1x8x128xf32>
    %12 = vector.shape_cast %11 : vector<1x8x128xf32> to vector<8x128xf32>
    %13 = vector.extract_strided_slice %2 {offsets = [1, 0, 2], sizes = [1, 8, 128], strides = [1, 1, 1]} : vector<2x8x256xf32> to vector<1x8x128xf32>
    %14 = vector.shape_cast %13 : vector<1x8x128xf32> to vector<8x128xf32>
    %15 = vector.extract_strided_slice %2 {offsets = [0, 0, 3], sizes = [1, 8, 128], strides = [1, 1, 1]} : vector<2x8x256xf32> to vector<1x8x128xf32>
    %16 = vector.shape_cast %15 : vector<1x8x128xf32> to vector<8x128xf32>
    %17 = vector.extract_strided_slice %2 {offsets = [1, 0, 3], sizes = [1, 8, 128], strides = [1, 1, 1]} : vector<2x8x256xf32> to vector<1x8x128xf32>
    %18 = vector.shape_cast %17 : vector<1x8x128xf32> to vector<8x128xf32>
    %19 = vector.extract_strided_slice %2 {offsets = [0, 0, 4], sizes = [1, 8, 128], strides = [1, 1, 1]} : vector<2x8x256xf32> to vector<1x8x128xf32>
    %20 = vector.shape_cast %19 : vector<1x8x128xf32> to vector<8x128xf32>
    %21 = vector.extract_strided_slice %2 {offsets = [1, 0, 4], sizes = [1, 8, 128], strides = [1, 1, 1]} : vector<2x8x256xf32> to vector<1x8x128xf32>
    %22 = vector.shape_cast %21 : vector<1x8x128xf32> to vector<8x128xf32>
    %23 = vector.extract_strided_slice %2 {offsets = [0, 0, 5], sizes = [1, 8, 128], strides = [1, 1, 1]} : vector<2x8x256xf32> to vector<1x8x128xf32>
    %24 = vector.shape_cast %23 : vector<1x8x128xf32> to vector<8x128xf32>
    %25 = vector.extract_strided_slice %2 {offsets = [1, 0, 5], sizes = [1, 8, 128], strides = [1, 1, 1]} : vector<2x8x256xf32> to vector<1x8x128xf32>
    %26 = vector.shape_cast %25 : vector<1x8x128xf32> to vector<8x128xf32>
    %27 = vector.extract_strided_slice %2 {offsets = [0, 0, 6], sizes = [1, 8, 128], strides = [1, 1, 1]} : vector<2x8x256xf32> to vector<1x8x128xf32>
    %28 = vector.shape_cast %27 : vector<1x8x128xf32> to vector<8x128xf32>
    %29 = vector.extract_strided_slice %2 {offsets = [1, 0, 6], sizes = [1, 8, 128], strides = [1, 1, 1]} : vector<2x8x256xf32> to vector<1x8x128xf32>
    %30 = vector.shape_cast %29 : vector<1x8x128xf32> to vector<8x128xf32>
    %31 = vector.extract_strided_slice %2 {offsets = [0, 0, 7], sizes = [1, 8, 128], strides = [1, 1, 1]} : vector<2x8x256xf32> to vector<1x8x128xf32>
    %32 = vector.shape_cast %31 : vector<1x8x128xf32> to vector<8x128xf32>
    %33 = vector.extract_strided_slice %2 {offsets = [1, 0, 7], sizes = [1, 8, 128], strides = [1, 1, 1]} : vector<2x8x256xf32> to vector<1x8x128xf32>
    %34 = vector.shape_cast %33 : vector<1x8x128xf32> to vector<8x128xf32>
    %35 = vector.shape_cast %4 : vector<8x128xf32> to vector<8x1x128xf32>
    %36 = vector.shape_cast %6 : vector<8x128xf32> to vector<8x1x128xf32>
    %37 = vector.shape_cast %8 : vector<8x128xf32> to vector<8x1x128xf32>
    %38 = vector.shape_cast %10 : vector<8x128xf32> to vector<8x1x128xf32>
    %39 = vector.shape_cast %12 : vector<8x128xf32> to vector<8x1x128xf32>
    %40 = vector.shape_cast %14 : vector<8x128xf32> to vector<8x1x128xf32>
    %41 = vector.shape_cast %16 : vector<8x128xf32> to vector<8x1x128xf32>
    %42 = vector.shape_cast %18 : vector<8x128xf32> to vector<8x1x128xf32>
    %43 = vector.shape_cast %20 : vector<8x128xf32> to vector<8x1x128xf32>
    %44 = vector.shape_cast %22 : vector<8x128xf32> to vector<8x1x128xf32>
    %45 = vector.shape_cast %24 : vector<8x128xf32> to vector<8x1x128xf32>
    %46 = vector.shape_cast %26 : vector<8x128xf32> to vector<8x1x128xf32>
    %47 = vector.shape_cast %28 : vector<8x128xf32> to vector<8x1x128xf32>
    %48 = vector.shape_cast %30 : vector<8x128xf32> to vector<8x1x128xf32>
    %49 = vector.shape_cast %32 : vector<8x128xf32> to vector<8x1x128xf32>
    %50 = vector.shape_cast %34 : vector<8x128xf32> to vector<8x1x128xf32>
    %51 = tpu.concatenate %35, %36, %37, %38, %39, %40, %41, %42, %43, %44, %45, %46, %47, %48, %49, %50 in 1 : vector<8x1x128xf32>, vector<8x1x128xf32>, vector<8x1x128xf32>, vector<8x1x128xf32>, vector<8x1x128xf32>, vector<8x1x128xf32>, vector<8x1x128xf32>, vector<8x1x128xf32>, vector<8x1x128xf32>, vector<8x1x128xf32>, vector<8x1x128xf32>, vector<8x1x128xf32>, vector<8x1x128xf32>, vector<8x1x128xf32>, vector<8x1x128xf32>, vector<8x1x128xf32> -> vector<8x16x128xf32>
    %c0_5 = arith.constant 0 : index
    %c0_6 = arith.constant 0 : index
    %52 = vector.load %arg2[%c0_5, %c0_6] : memref<8x16xf32, #tpu.memory_space<vmem>>, vector<8x16xf32>
    %53 = vector.shape_cast %52 : vector<8x16xf32> to vector<1x8x16xf32>
    %54 = vector.shape_cast %53 : vector<1x8x16xf32> to vector<1x8x16xf32>
    %55 = vector.broadcast %54 : vector<1x8x16xf32> to vector<8x8x16xf32>
    "tpu.trace_start"() <{level = 10 : i32, message = "bpk,bkf->bpf"}> : () -> ()
    %cst = arith.constant dense<0.000000e+00> : vector<8x8x128xf32>
    %56 = tpu.matmul %55, %51, %cst {dimension_numbers = #tpu.dot_dimension_numbers<[2], [1], [1], [2], [0, 0, 0, 1, 1, 2], [0], [0]>} : vector<8x8x16xf32>, vector<8x16x128xf32>, vector<8x8x128xf32> -> vector<8x8x128xf32>
    "tpu.trace_stop"() : () -> ()
    %57 = vector.extract_strided_slice %56 {offsets = [0, 0, 0], sizes = [8, 3, 128], strides = [1, 1, 1]} : vector<8x8x128xf32> to vector<8x3x128xf32>
    %c0_7 = arith.constant 0 : index
    %c0_8 = arith.constant 0 : index
    %c0_9 = arith.constant 0 : index
    %58 = vector.load %arg5[%c0_7, %c0_8, %c0_9] : memref<8x3x128xf32, #tpu.memory_space<vmem>>, vector<8x3x128xf32>
    tpu.vector_store %arg5[%c0_7, %c0_8, %c0_9], %57 {strides = array<i32>} : memref<8x3x128xf32, #tpu.memory_space<vmem>>, vector<8x3x128xf32>,
    return
  }
  func.func @transform_0(%arg0: i32, %arg1: i32) -> (i32, i32) {
    %c0_i32 = arith.constant 0 : i32
    %c0_i32_0 = arith.constant 0 : i32
    %c0_i32_1 = arith.constant 0 : i32
    return %c0_i32, %c0_i32_0 : i32, i32
  }
  func.func @transform_1(%arg0: i32, %arg1: i32) -> (i32, i32, i32) {
    %c0_i32 = arith.constant 0 : i32
    %c0_i32_0 = arith.constant 0 : i32
    return %c0_i32, %arg0, %arg1 : i32, i32, i32
  }
  func.func @transform_2(%arg0: i32, %arg1: i32) -> (i32, i32, i32) {
    %c1_i32 = arith.constant 1 : i32
    %0 = arith.addi %arg1, %c1_i32 : i32
    %c1_i32_0 = arith.constant 1 : i32
    %1 = arith.muli %0, %c1_i32_0 : i32
    %c0_i32 = arith.constant 0 : i32
    %c0_i32_1 = arith.constant 0 : i32
    return %c0_i32, %arg0, %1 : i32, i32, i32
  }
  func.func @transform_3(%arg0: i32, %arg1: i32) -> (i32, i32, i32) {
    %c0_i32 = arith.constant 0 : i32
    %c0_i32_0 = arith.constant 0 : i32
    return %arg0, %c0_i32, %arg1 : i32, i32, i32
  }
}

</mosaic_0001>

<bundles_post_ra>
// kernel: tpu_custom_call.1
= control target key start
LH: loop header
LB: loop body
LE: loop exit
PB: predicated region body
PF: predicated region fallthrough
CT: control target
= control target key end

     0   :  { %8 = vsyncpa [#allocation3], 0  ;;  %s3610_s0 = inlined_call_operand.hbm [shape: f32[8,16], index: 0, kind: input, shape index: {}]   ;;  %s3611_s1 = inlined_call_operand.hbm [shape: f32[2,8,256], index: 1, kind: input, shape index: {}]   ;;  %s3612_s2 = inlined_call_operand.hbm [shape: f32[2,8,256], index: 2, kind: input, shape index: {}]   ;;  %s3613_s3 = inlined_call_operand.vmem [shape: f32[8,3,128], index: 3, kind: output, shape index: {}]  }
   0x1   :  { %9 = vsyncpa [#allocation5], 0  ;;  %s2581_s12 = smov [#allocation4]   ;;  %s2508_s16 = scalar_lea.hbm %s3611_s1, 256 }
   0x2   :  { %s25_s13 = sshll.u32 %s2581_s12, 4  ;;  %p2509_p0 = scmp.ne.s32.totalorder %s3611_s1, %s2508_s16  ;;  %s26_s13 = int_to_ptr.vmem [resolvable:$true] %s25_s13 }
   0x3   :  { %s2510_s21 = scalar_lea.hbm %s3611_s1, 512  ;;  %p2512_p2 = scmp.lt.u32.totalorder %s2508_s16, %s3611_s1 }
   0x4   :  { %p2511_p1 = scmp.lt.u32.totalorder %s2510_s21, %s2508_s16 }
   0x6   :  { %p2513_p3 = por %p2512_p2, %p2511_p1 }
   0x8   :  { %p2514_p4 = pnand %p2513_p3, %p2509_p0 }
   0xa   :  { %2517 = shalt.err (!%p2514_p4)
}
   0xb   :  { %s2518_s24 = scalar_lea.vmem %s26_s13, 256  ;;  %p2523_p6 = scmp.lt.s32.totalorder %s26_s13, %s26_s13 }
   0xc   :  { %p2519_p5 = scmp.ne.s32.totalorder %s26_s13, %s2518_s24  ;;  %p2524_p7 = scmp.lt.s32.totalorder %s2518_s24, %s2518_s24 }
   0xe   :  { %p2525_p8 = por %p2524_p7, %p2523_p6 }
  0x10   :  { %p2526_p9 = pnand %p2525_p8, %p2519_p5 }
  0x12   :  { %2529 = shalt.err (!%p2526_p9)
}
  0x13   :  { %s2582_s25 = smov 256   ;;  %s2583_s26 = smov 128  }
  0x14   :  { %s2584_s27 = smov 8   ;;  %s2639_s5 = scalar_lea.hbm %s3612_s2, 128 }
  0x15   :  { %31 = dma.hbm_to_vmem [thread:$0]  %s3611_s1, 256, %s26_s13, [#allocation5], %s2582_s25, %s2583_s26, %s2584_s27  }
  0x16   :  { %s2585_s6 = smov [#allocation2]   ;;  %s2586_s8 = smov [#allocation6]  }
  0x17   :  { %s16_s7 = sshll.u32 %s2585_s6, 4  ;;  %s40_s9 = sshll.u32 %s2586_s8, 4  ;;  %s17_s7 = int_to_ptr.vmem [resolvable:$true] %s16_s7  ;;  %s41_s9 = int_to_ptr.vmem [resolvable:$true] %s40_s9 }
  0x18   :  { %s2530_s12 = scalar_lea.hbm %s3610_s0, 128 }
  0x19   :  { %p2531_p10 = scmp.ne.s32.totalorder %s3610_s0, %s2530_s12  ;;  %p2534_p11 = scmp.lt.u32.totalorder %s2530_s12, %s3610_s0 }
  0x1b   :  { %p2536_p12 = pnand %p2534_p11, %p2531_p10 }
  0x1d   :  { %2539 = shalt.err (!%p2536_p12)
}
  0x1e   :  { %s2540_s13 = scalar_lea.vmem %s17_s7, 128  ;;  %p2545_p0 = scmp.lt.s32.totalorder %s17_s7, %s17_s7 }
  0x1f   :  { %p2541_p13 = scmp.ne.s32.totalorder %s17_s7, %s2540_s13  ;;  %p2546_p1 = scmp.lt.s32.totalorder %s2540_s13, %s2540_s13 }
  0x21   :  { %p2547_p2 = por %p2546_p1, %p2545_p0 }
  0x23   :  { %p2548_p3 = pnand %p2547_p2, %p2541_p13 }
  0x25   :  { %2551 = shalt.err (!%p2548_p3)
}
  0x26   :  { %19 = dma.hbm_to_vmem [thread:$0]  %s3610_s0, 128, %s17_s7, [#allocation3]  }
  0x27   :  { %s2576_s21 = scalar_lea.hbm %s3612_s2, 384  ;;  %s2554_s24 = scalar_lea.hbm %s3612_s2, 512 }
  0x28   :  { %p2553_p4 = scmp.ne.s32.totalorder %s2639_s5, %s2576_s21  ;;  %p2555_p5 = scmp.lt.u32.totalorder %s2639_s5, %s3612_s2 }
  0x29   :  { %p2556_p6 = scmp.lt.u32.totalorder %s2554_s24, %s2576_s21  ;;  %p2558_p8 = scmp.lt.u32.totalorder %s2576_s21, %s2639_s5 }
  0x2b   :  { %p2557_p7 = por %p2556_p6, %p2555_p5 }
  0x2d   :  { %p2559_p9 = por %p2558_p8, %p2557_p7 }
  0x2f   :  { %p2560_p10 = pnand %p2559_p9, %p2553_p4 }
  0x31   :  { %2563 = shalt.err (!%p2560_p10)
}
  0x32   :  { %s2564_s0 = scalar_lea.vmem %s41_s9, 256  ;;  %p2569_p12 = scmp.lt.s32.totalorder %s41_s9, %s41_s9 }
  0x33   :  { %p2565_p11 = scmp.ne.s32.totalorder %s41_s9, %s2564_s0  ;;  %p2570_p13 = scmp.lt.s32.totalorder %s2564_s0, %s2564_s0 }
  0x35   :  { %p2571_p0 = por %p2570_p13, %p2569_p12 }
  0x37   :  { %p2572_p1 = pnand %p2571_p0, %p2565_p11 }
  0x39   :  { %2575 = shalt.err (!%p2572_p1)
}
  0x3a   :  { %46 = dma.hbm_to_vmem [thread:$0]  %s2639_s5, 256, %s41_s9, [#allocation5], %s2582_s25, %s2583_s26, %s2584_s27  }
  0x3b   :  { %2577 = dma.done.wait [#allocation3], 128  }
  0x3c   :  { %2578 = vsyncadd [#allocation3], 4294967168 }
  0x3d   :  { %2579 = dma.done.wait [#allocation5], 512  }
  0x3e   :  { %2580 = vsyncadd [#allocation5], 4294966784  ;;  %v66_v0 = vlaneseq  ;;  %v2587_v1 = vmov 1966171168   ;;  %v57_v6 = vld [vmem:[#allocation4] sm:$0xff]  ;;  %v59_v7 = vld [vmem:[#allocation6] sm:$0xff] }
  0x3f   :  { %v64_v2 = vunpack.c.l.s4 %v2587_v1  ;;  %v58_v9 = vld [vmem:[#allocation4 + $0x8] sm:$0xff]  ;;  %v170_v10 = vcombine.low %v57_v6, %v59_v7  ;;  %v171_v11 = vcombine.high %v57_v6, %v59_v7  ;;  %v60_v12 = vld [vmem:[#allocation6 + $0x8] sm:$0xff]  ;;  %v62_v18 = vcombine.high %v57_v6, %v57_v6  ;;  %s2588_s2 = smov 127   ;;  %s2589_s25 = smov 126  }
  0x40   :  { %v67_v3 = vshrl.u32 %v66_v0, 7  ;;  %v221_v16 = vcombine.low %v58_v9, %v60_v12  ;;  %v120_v17 = vcombine.high %v58_v9, %v58_v9  ;;  %v222_v24 = vcombine.high %v58_v9, %v60_v12  ;;  %s2590_s26 = smov 125   ;;  %s2591_s27 = smov 124  }
  0x41   :  { %v65_v4 = vunpack.c.0.s8 %v64_v2  ;;  %vm1118_vm0 = vcmask 1040384   ;;  %s2592_s30 = smov 123   ;;  %s2593_s4 = smov 122   ;;  %vm407_vm1 = vcmask 1039360   ;;  %vm1127_vm2 = vcmask 1041408  }
  0x42   :  { %v2671_v8 = vsub.s32 0, %v67_v3  ;;  %v2679_v15 = vsub.s32 1, %v67_v3  ;;  %s2594_s5 = smov 121   ;;  %vm1136_vm3 = vcmask 1042432   ;;  %vm568_vm4 = vcmask 1031168  }
  0x43   :  { %v2669_v5 = vsub.s32 %v65_v4, %v67_v3  ;;  %vm1145_vm5 = vcmask 1043456   ;;  %vm2596_vm6 = vmmov 0   ;;  %vm1154_vm7 = vcmask 1044480  }
  0x44   :  { %vm665_vm8 = vcmask 1022976   ;;  %vm1163_vm9 = vcmask 1045504   ;;  %vm762_vm10 = vcmask 1014784   ;;  %vm859_vm11 = vcmask 1006592  }
  0x45   :  { %v2674_v13 = vrot.slane %v58_v9, %v2669_v5  ;;  %v2677_v14 = vrot.slane %v57_v6, %v2669_v5  ;;  %v178_v19 = vrot.slane %v170_v10, %v2669_v5  ;;  %v185_v20 = vrot.slane %v171_v11, %v2669_v5 }
  0x46   :  { %v229_v23 = vrot.slane %v221_v16, %v2669_v5  ;;  %v2693_v25 = vrot.slane %v120_v17, %v2669_v5  ;;  %v2696_v26 = vrot.slane %v62_v18, %v2669_v5  ;;  %v236_v39 = vrot.slane %v222_v24, %v2669_v5 }
  0x47   :  { %v2685_v21 = vrot.slane %v2674_v13, %v2669_v5  ;;  %v2689_v22 = vrot.slane %v2677_v14, %v2669_v5  ;;  %v194_v27 = vrot.slane %v178_v19, %v2669_v5  ;;  %v201_v28 = vrot.slane %v185_v20, %v2669_v5 }
  0x48   :  { %v187_v29 = vcombine.high %v185_v20, %v185_v20  ;;  %v186_v30 = vcombine.high %v178_v19, %v178_v19  ;;  %v245_v31 = vrot.slane %v229_v23, %v2669_v5  ;;  %v237_v32 = vcombine.high %v229_v23, %v229_v23 }
  0x49   :  { %v314_v33 = vrot.slane %v194_v27, %v2671_v8  ;;  %v318_v34 = vrot.slane %v194_v27, %v2679_v15  ;;  %v216_v35 = vcombine.high %v194_v27, %v194_v27  ;;  %v346_v36 = vrot.slane %v201_v28, %v2671_v8 }
  0x4a   :  { %v350_v37 = vrot.slane %v201_v28, %v2679_v15  ;;  %v215_v38 = vrot.slane %v187_v29, %v2669_v5  ;;  %v259_v43 = vrot.slane %v237_v32, %v2669_v5  ;;  %v2715_v46 = vrot.slane %v245_v31, %v2671_v8 }
  0x4b   :  { %v2707_v40 = vpack.i.bf16 %v318_v34, %v314_v33  ;;  %v330_v41 = vrot.slane %v216_v35, %v2671_v8  ;;  %v334_v42 = vrot.slane %v216_v35, %v2679_v15  ;;  %v2724_v49 = vrot.slane %v245_v31, %v2679_v15 }
  0x4c   :  { %v354_v44 = vrot.slane %v215_v38, %v2671_v8  ;;  %v358_v45 = vrot.slane %v215_v38, %v2679_v15  ;;  %v2721_v48 = vpack.i.bf16 %v350_v37, %v346_v36  ;;  %v208_v50 = vrot.slane %v186_v30, %v2669_v5 }
  0x4d   :  { %1947 = vrot.lane.b32.xlu0 %v2707_v40, %s2588_s2  ;;  %v2719_v47 = vpack.i.bf16 %v334_v42, %v330_v41  ;;  %v238_v51 = vcombine.high %v236_v39, %v236_v39  ;;  %v2732_v53 = vrot.slane %v259_v43, %v2671_v8  ;;  %v2735_v54 = vrot.slane %v259_v43, %v2679_v15 }
  0x4e   :  { %v2729_v52 = vpack.i.bf16 %v358_v45, %v354_v44  ;;  %v218_v55 = vcombine.high %v208_v50, %v208_v50  ;;  %v217_v56 = vcombine.high %v201_v28, %v201_v28  ;;  %v219_v57 = vcombine.high %v215_v38, %v215_v38 }
  0x4f   :  { %1967 = vrot.lane.b32.xlu1 %v2719_v47, %s2588_s2  ;;  %v2741_v58 = vpack.i.bf16 %v2724_v49, %v2715_v46  ;;  %v322_v59 = vrot.slane %v208_v50, %v2671_v8  ;;  %v326_v60 = vrot.slane %v208_v50, %v2679_v15  ;;  %v267_v61 = vcombine.high %v245_v31, %v245_v31 }
  0x50   :  { %v269_v62 = vcombine.high %v259_v43, %v259_v43  ;;  %v252_v63 = vrot.slane %v236_v39, %v2669_v5  ;;  %v2750_v0 = vpack.i.bf16 %v2735_v54, %v2732_v53  ;;  %v338_v1 = vrot.slane %v218_v55, %v2671_v8 }
  0x51   :  { %1952 = vrot.lane.b32.xlu0 %v2721_v48, %s2588_s2  ;;  %v342_v2 = vrot.slane %v218_v55, %v2679_v15  ;;  %v266_v3 = vrot.slane %v238_v51, %v2669_v5  ;;  %v2756_v4 = vrot.slane %v217_v56, %v2671_v8  ;;  %v2759_v6 = vrot.slane %v217_v56, %v2679_v15 }
  0x52   :  { %v370_v7 = vrot.slane %v219_v57, %v2671_v8  ;;  %v268_v9 = vcombine.high %v252_v63, %v252_v63  ;;  %v2764_v10 = vpack.i.bf16 %v326_v60, %v322_v59  ;;  %v374_v11 = vrot.slane %v219_v57, %v2679_v15 }
  0x53   :  { %1972 = vrot.lane.b32.xlu1 %v2729_v52, %s2588_s2  ;;  %v2768_v12 = vrot.slane %v267_v61, %v2671_v8  ;;  %v2771_v16 = vrot.slane %v267_v61, %v2679_v15  ;;  %v2774_v17 = vrot.slane %v269_v62, %v2671_v8  ;;  %v2777_v18 = vrot.slane %v269_v62, %v2679_v15 }
  0x54   :  { %v2780_v19 = vrot.slane %v252_v63, %v2671_v8  ;;  %v2783_v20 = vrot.slane %v252_v63, %v2679_v15  ;;  %v2787_v23 = vpack.i.bf16 %v342_v2, %v338_v1  ;;  %v2790_v24 = vrot.slane %v266_v3, %v2671_v8 }
  0x55   :  { %1957 = vrot.lane.b32.xlu0 %v2741_v58, %s2588_s2  ;;  %v2793_v27 = vrot.slane %v266_v3, %v2679_v15  ;;  %v270_v28 = vcombine.high %v266_v3, %v266_v3  ;;  %v475_v29 = vrot.slane %v268_v9, %v2671_v8  ;;  %v479_v30 = vrot.slane %v268_v9, %v2679_v15 }
  0x56   :  { %v2801_v31 = vpack.i.bf16 %v2759_v6, %v2756_v4  ;;  %v2803_v32 = vpack.i.bf16 %v374_v11, %v370_v7  ;;  %v2807_v33 = vpack.i.bf16 %v2771_v16, %v2768_v12  ;;  %v2811_v34 = vpack.i.bf16 %v2777_v18, %v2774_v17 }
  0x57   :  { %1982 = vrot.lane.b32.xlu1 %v2750_v0, %s2588_s2  ;;  %v2815_v35 = vpack.i.bf16 %v2783_v20, %v2780_v19  ;;  %v2821_v36 = vpack.i.bf16 %v2793_v27, %v2790_v24  ;;  %v483_v37 = vrot.slane %v270_v28, %v2671_v8  ;;  %v487_v38 = vrot.slane %v270_v28, %v2679_v15 }
  0x58   :  { %v2825_v39 = vpack.i.bf16 %v479_v30, %v475_v29  ;;  %v274_v41 = vrot.slane %v2685_v21, %v2671_v8  ;;  %v165_v42 = vcombine.high %v2685_v21, %v2685_v21  ;;  %v107_v15 = vcombine.high %v2689_v22, %v2689_v22 }
  0x59   :  { %1962 = vrot.lane.b32.xlu0 %v2764_v10, %s2588_s2  ;;  %v150_v43 = vrot.slane %v2693_v25, %v2669_v5  ;;  %v92_v44 = vrot.slane %v2696_v26, %v2669_v5  ;;  %v2241_v21 = vpack.i.bf16 %v2732_v53, %v2724_v49  ;;  %v136_v51 = vcombine.high %v2693_v25, %v2693_v25 }
  0x5a   :  { %v2847_v45 = vsel %vm1118_vm0, %v2689_v22, %v274_v41  ;;  %v282_v50 = vrot.slane %v165_v42, %v2671_v8  ;;  %v2856_v55 = vpack.i.bf16 %v487_v38, %v483_v37  ;;  %v78_v57 = vcombine.high %v2696_v26, %v2696_v26 }
  0x5b   :  { %1997 = vrot.lane.b32.xlu1 %v2787_v23, %s2588_s2  ;;  %v290_v56 = vrot.slane %v150_v43, %v2671_v8  ;;  %v2246_v22 = vpack.i.bf16 %v2768_v12, %v2735_v54  ;;  %v164_v60 = vrot.slane %v136_v51, %v2669_v5  ;;  %v135_v62 = vcombine.high %v2674_v13, %v2674_v13 }
  0x5c   :  { %v2864_v59 = vsel %vm1118_vm0, %v107_v15, %v282_v50  ;;  %v106_v61 = vrot.slane %v78_v57, %v2669_v5  ;;  %v77_v26 = vcombine.high %v2677_v14, %v2677_v14  ;;  %v166_v1 = vcombine.high %v150_v43, %v150_v43 }
  0x5d   :  { %1977 = vrot.lane.b32.xlu0 %v2801_v31, %s2588_s2  ;;  %v2870_v25 = vsel %vm1118_vm0, %v92_v44, %v290_v56  ;;  %v294_v63 = vrot.slane %v164_v60, %v2671_v8  ;;  %v157_v2 = vrot.slane %v135_v62, %v2669_v5  ;;  %v108_v7 = vcombine.high %v92_v44, %v92_v44 }
  0x5e   :  { %v99_v3 = vrot.slane %v77_v26, %v2669_v5  ;;  %v298_v11 = vrot.slane %v166_v1, %v2671_v8  ;;  %v168_v13 = vcombine.high %v164_v60, %v164_v60  ;;  %v110_v30 = vcombine.high %v106_v61, %v106_v61 }
  0x5f   :  { %2002 = vrot.lane.b32.xlu1 %v2803_v32, %s2588_s2  ;;  %v2883_v9 = vsel %vm1118_vm0, %v106_v61, %v294_v63  ;;  %v278_v14 = vrot.slane %v157_v2, %v2671_v8  ;;  %v167_v28 = vcombine.high %v157_v2, %v157_v2  ;;  %v2331_v43 = vpack.i.bf16 %v2774_v17, %v2771_v16 }
  0x60   :  { %v109_v29 = vcombine.high %v99_v3, %v99_v3  ;;  %v2890_v37 = vsel %vm1118_vm0, %v108_v7, %v298_v11  ;;  %v302_v5 = vrot.slane %v168_v13, %v2671_v8  ;;  %v2336_v44 = vpack.i.bf16 %v2780_v19, %v2777_v18 }
  0x61   :  { %1987 = vrot.lane.b32.xlu0 %v2807_v33, %s2588_s2  ;;  %v2895_v38 = vsel %vm1118_vm0, %v99_v3, %v278_v14  ;;  %v286_v41 = vrot.slane %v167_v28, %v2671_v8  ;;  %v2421_v8 = vpack.i.bf16 %v2790_v24, %v2783_v20  ;;  %v2136_v50 = vpack.i.bf16 %v2715_v46, %v2756_v4 }
  0x62   :  { %v2899_v42 = vsel %vm1118_vm0, %v110_v30, %v302_v5  ;;  %v2595_v56 = vmov 0.0|0.0   ;;  %vm956_vm12 = vcmask 998400   ;;  %vm1053_vm13 = vcmask 990208  }
  0x63   :  { %2007 = vrot.lane.b32.xlu1 %v2811_v34, %s2588_s2  ;;  %v2903_v15 = vsel %vm1118_vm0, %v109_v29, %v286_v41  ;;  %1905 = vmatprep.subr.bf16.mxu0 %v2595_v56  ;;  %vm1172_vm14 = vcmask 1046528   ;;  %vm1238_vm15 = vcmask 130048  }
  0x64   :  { %1908 = vmatprep.subr.bf16.mxu1 %v2595_v56 }
  0x65   :  { %1992 = vrot.lane.b32.xlu0 %v2815_v35, %s2588_s2 }
  0x67   :  { %2012 = vrot.lane.b32.xlu1 %v2821_v36, %s2588_s2 }
  0x69   :  { %2017 = vrot.lane.b32.xlu0 %v2825_v39, %s2588_s2 }
  0x6b   :  { %2022 = vrot.lane.b32.xlu1 %v2856_v55, %s2588_s2 }
  0x6d   :  { %2027 = vrot.lane.b32.xlu0 %v2707_v40, %s2589_s25 }
  0x6f   :  { %2032 = vrot.lane.b32.xlu1 %v2764_v10, %s2589_s25 }
  0x71   :  { %2037 = vrot.lane.b32.xlu0 %v2719_v47, %s2589_s25 }
  0x73   :  { %2042 = vrot.lane.b32.xlu1 %v2787_v23, %s2589_s25 }
  0x75   :  { %2047 = vrot.lane.b32.xlu0 %v2721_v48, %s2589_s25 }
  0x77   :  { %2052 = vrot.lane.b32.xlu1 %v2729_v52, %s2589_s25 }
  0x79   :  { %2057 = vrot.lane.b32.xlu0 %v2801_v31, %s2589_s25 }
  0x7b   :  { %2062 = vrot.lane.b32.xlu1 %v2803_v32, %s2589_s25 }
  0x7d   :  { %2067 = vrot.lane.b32.xlu0 %v2741_v58, %s2589_s25 }
  0x7f   :  { %2072 = vrot.lane.b32.xlu1 %v2750_v0, %s2589_s25 }
  0x81   :  { %2077 = vrot.lane.b32.xlu0 %v2807_v33, %s2589_s25 }
  0x83   :  { %2082 = vrot.lane.b32.xlu1 %v2811_v34, %s2589_s25 }
  0x85   :  { %2087 = vrot.lane.b32.xlu0 %v2815_v35, %s2589_s25 }
  0x87   :  { %2092 = vrot.lane.b32.xlu1 %v2821_v36, %s2589_s25 }
  0x89   :  { %2097 = vrot.lane.b32.xlu0 %v2825_v39, %s2589_s25 }
  0x8b   :  { %2102 = vrot.lane.b32.xlu1 %v2856_v55, %s2589_s25 }
  0x8d   :  { %2107 = vrot.lane.b32.xlu0 %v2707_v40, %s2590_s26 }
  0x8f   :  { %2112 = vrot.lane.b32.xlu1 %v2764_v10, %s2590_s26 }
  0x91   :  { %2117 = vrot.lane.b32.xlu0 %v2719_v47, %s2590_s26 }
  0x93   :  { %2122 = vrot.lane.b32.xlu1 %v2787_v23, %s2590_s26 }
  0x95   :  { %2127 = vrot.lane.b32.xlu0 %v2721_v48, %s2590_s26 }
  0x97   :  { %2132 = vrot.lane.b32.xlu1 %v2729_v52, %s2590_s26 }
  0x99   :  { %2137 = vrot.lane.b32.xlu0 %v2136_v50, %s2590_s26 }
  0x9b   :  { %2142 = vrot.lane.b32.xlu1 %v2707_v40, %s2591_s27 }
  0x9d   :  { %2147 = vrot.lane.b32.xlu0 %v2764_v10, %s2591_s27 }
  0x9f   :  { %2152 = vrot.lane.b32.xlu1 %v2741_v58, %s2591_s27 }
  0xa1   :  { %2157 = vrot.lane.b32.xlu0 %v2750_v0, %s2591_s27 }
  0xa3   :  { %2162 = vrot.lane.b32.xlu1 %v2707_v40, %s2592_s30 }
  0xa5   :  { %2167 = vrot.lane.b32.xlu0 %v2764_v10, %s2592_s30 }
  0xa7   :  { %2172 = vrot.lane.b32.xlu1 %v2741_v58, %s2592_s30 }
  0xa9   :  { %2177 = vrot.lane.b32.xlu0 %v2750_v0, %s2592_s30 }
  0xab   :  { %2182 = vrot.lane.b32.xlu1 %v2707_v40, %s2593_s4 }
  0xad   :  { %2187 = vrot.lane.b32.xlu0 %v2764_v10, %s2593_s4 }
  0xaf   :  { %2192 = vrot.lane.b32.xlu1 %v2719_v47, %s2591_s27 }
  0xb1   :  { %2197 = vrot.lane.b32.xlu0 %v2787_v23, %s2591_s27 }
  0xb3   :  { %2202 = vrot.lane.b32.xlu1 %v2807_v33, %s2591_s27 }
  0xb5   :  { %2207 = vrot.lane.b32.xlu0 %v2811_v34, %s2591_s27 }
  0xb7   :  { %2212 = vrot.lane.b32.xlu1 %v2741_v58, %s2593_s4 }
  0xb9   :  { %2217 = vrot.lane.b32.xlu0 %v2750_v0, %s2593_s4 }
  0xbb   :  { %2222 = vrot.lane.b32.xlu1 %v2719_v47, %s2592_s30 }
  0xbd   :  { %2227 = vrot.lane.b32.xlu0 %v2787_v23, %s2592_s30 }
  0xbf   :  { %v1948_v46 = vpop.permute.xlu0 %1947  ;;  %2232 = vrot.lane.b32.xlu1 %v2707_v40, %s2594_s5 }
  0xc0   :  { %v1949_v11 = vunpack.i.l.bf16 %v1948_v46 }
  0xc1   :  { %v2978_v4 = vpop.permute.xlu1 %1967  ;;  %2237 = vrot.lane.b32.xlu0 %v2764_v10, %s2594_s5 }
  0xc2   :  { %v1970_v5 = vunpack.i.h.bf16 %v2978_v4 }
  0xc3   :  { %v1953_v51 = vpop.permute.xlu0 %1952  ;;  %2242 = vrot.lane.b32.xlu1 %v2241_v21, %s2590_s26 }
  0xc4   :  { %v1955_v57 = vunpack.i.h.bf16 %v1953_v51  ;;  %v1954_v60 = vunpack.i.l.bf16 %v1953_v51 }
  0xc5   :  { %v1973_v40 = vpop.permute.xlu1 %1972  ;;  %2247 = vrot.lane.b32.xlu0 %v2246_v22, %s2590_s26 }
  0xc6   :  { %v412_v10 = vsel %vm407_vm1, %v1954_v60, %v1955_v57  ;;  %v1975_v61 = vunpack.i.h.bf16 %v1973_v40  ;;  %v1974_v49 = vunpack.i.l.bf16 %v1973_v40 }
  0xc7   :  { %v1132_v53 = vsel %vm1127_vm2, %v2870_v25, %v412_v10  ;;  %v1958_v21 = vpop.permute.xlu0 %1957  ;;  %2252 = vrot.lane.b32.xlu1 %v2807_v33, %s2592_s30 }
  0xc8   :  { %v413_v62 = vsel %vm407_vm1, %v1974_v49, %v1975_v61  ;;  %v1960_v50 = vunpack.i.h.bf16 %v1958_v21 }
  0xc9   :  { %v1133_v26 = vsel %vm1127_vm2, %v2883_v9, %v413_v62  ;;  %v3000_v63 = vpop.permute.xlu1 %1982  ;;  %2257 = vrot.lane.b32.xlu0 %v2811_v34, %s2592_s30 }
  0xcb   :  { %v1963_v54 = vpop.permute.xlu0 %1962  ;;  %2262 = vrot.lane.b32.xlu1 %v2741_v58, %s2594_s5  ;;  %v1950_v58 = vunpack.i.h.bf16 %v1948_v46  ;;  %v1959_v46 = vunpack.i.l.bf16 %v1958_v21 }
  0xcc   :  { %v1964_v60 = vunpack.i.l.bf16 %v1963_v54 }
  0xcd   :  { %2267 = vrot.lane.b32.xlu0 %v2750_v0, %s2594_s5  ;;  %v3008_v12 = vpop.permute.xlu1 %1997  ;;  %v408_v30 = vsel %vm407_vm1, %v1949_v11, %v1950_v58 }
  0xcf   :  { %v1978_v22 = vpop.permute.xlu0 %1977  ;;  %2272 = vrot.lane.b32.xlu1 %v2719_v47, %s2593_s4 }
  0xd0   :  { %v1980_v25 = vunpack.i.h.bf16 %v1978_v22  ;;  %v1979_v1 = vunpack.i.l.bf16 %v1978_v22 }
  0xd1   :  { %2277 = vrot.lane.b32.xlu0 %v2787_v23, %s2593_s4  ;;  %v2003_v2 = vpop.permute.xlu1 %2002 }
  0xd2   :  { %v414_v3 = vsel %vm407_vm1, %v1979_v1, %v1980_v25  ;;  %v2005_v7 = vunpack.i.h.bf16 %v2003_v2  ;;  %v2004_v9 = vunpack.i.l.bf16 %v2003_v2 }
  0xd3   :  { %v1134_v0 = vsel %vm1127_vm2, %v2890_v37, %v414_v3  ;;  %v1988_v13 = vpop.permute.xlu0 %1987  ;;  %2282 = vrot.lane.b32.xlu1 %v2721_v48, %s2591_s27  ;;  %v1969_v37 = vunpack.i.l.bf16 %v2978_v4  ;;  %v1128_v4 = vsel %vm1127_vm2, %v2847_v45, %v408_v30  ;;  %v1985_v3 = vunpack.i.h.bf16 %v3000_v63 }
  0xd4   :  { %v415_v14 = vsel %vm407_vm1, %v2004_v9, %v2005_v7  ;;  %v1990_v7 = vunpack.i.h.bf16 %v1988_v13  ;;  %v1989_v58 = vunpack.i.l.bf16 %v1988_v13 }
  0xd5   :  { %v1135_v28 = vsel %vm1127_vm2, %v2899_v42, %v415_v14  ;;  %2287 = vrot.lane.b32.xlu0 %v2729_v52, %s2591_s27  ;;  %v3024_v29 = vpop.permute.xlu1 %2007  ;;  %v1965_v42 = vunpack.i.h.bf16 %v1963_v54  ;;  %v410_v62 = vsel %vm407_vm1, %v1969_v37, %v1970_v5  ;;  %v520_v54 = vsel %vm407_vm1, %v1959_v46, %v1960_v50 }
  0xd6   :  { %v1984_v5 = vunpack.i.l.bf16 %v3000_v63  ;;  %v2000_v37 = vunpack.i.h.bf16 %v3008_v12  ;;  %v1137_v46 = vsel %vm1136_vm3, %v1128_v4, %v520_v54 }
  0xd7   :  { %v1993_v41 = vpop.permute.xlu0 %1992  ;;  %2292 = vrot.lane.b32.xlu1 %v2815_v35, %s2591_s27  ;;  %v409_v45 = vsel %vm407_vm1, %v1964_v60, %v1965_v42  ;;  %v2010_v42 = vunpack.i.h.bf16 %v3024_v29 }
  0xd8   :  { %v1995_v51 = vunpack.i.h.bf16 %v1993_v41  ;;  %v1994_v57 = vunpack.i.l.bf16 %v1993_v41  ;;  %v1999_v41 = vunpack.i.l.bf16 %v3008_v12  ;;  %v1129_v63 = vsel %vm1127_vm2, %v2895_v38, %v409_v45 }
  0xd9   :  { %2297 = vrot.lane.b32.xlu0 %v2821_v36, %s2591_s27  ;;  %v2013_v40 = vpop.permute.xlu1 %2012  ;;  %v2009_v12 = vunpack.i.l.bf16 %v3024_v29  ;;  %v1130_v38 = vsel %vm1127_vm2, %v2864_v59, %v410_v62  ;;  %v521_v4 = vsel %vm407_vm1, %v1984_v5, %v1985_v3 }
  0xda   :  { %v524_v10 = vsel %vm407_vm1, %v1994_v57, %v1995_v51  ;;  %v2015_v61 = vunpack.i.h.bf16 %v2013_v40  ;;  %v2014_v49 = vunpack.i.l.bf16 %v2013_v40  ;;  %v522_v40 = vsel %vm407_vm1, %v1989_v58, %v1990_v7 }
  0xdb   :  { %v3038_v21 = vsel %vm1136_vm3, %v1132_v53, %v524_v10  ;;  %v2018_v22 = vpop.permute.xlu0 %2017  ;;  %2302 = vrot.lane.b32.xlu1 %v2807_v33, %s2593_s4  ;;  %v411_v29 = vsel %vm407_vm1, %v1999_v41, %v2000_v37  ;;  %v1139_v45 = vsel %vm1136_vm3, %v1130_v38, %v522_v40  ;;  %v523_v59 = vsel %vm407_vm1, %v2009_v12, %v2010_v42 }
  0xdc   :  { %v525_v25 = vsel %vm407_vm1, %v2014_v49, %v2015_v61  ;;  %v2020_v1 = vunpack.i.h.bf16 %v2018_v22  ;;  %v2019_v2 = vunpack.i.l.bf16 %v2018_v22  ;;  %v1131_v58 = vsel %vm1127_vm2, %v2903_v15, %v411_v29 }
  0xdd   :  { %v3047_v9 = vsel %vm1136_vm3, %v1133_v26, %v525_v25  ;;  %2307 = vrot.lane.b32.xlu0 %v2811_v34, %s2593_s4  ;;  %v2023_v53 = vpop.permute.xlu1 %2022  ;;  %v1138_v25 = vsel %vm1136_vm3, %v1129_v63, %v521_v4  ;;  %v2597_v41 = vmov 0.0  }
  0xde   :  { %v526_v11 = vsel %vm407_vm1, %v2019_v2, %v2020_v1  ;;  %v2025_v14 = vunpack.i.h.bf16 %v2023_v53  ;;  %v2024_v30 = vunpack.i.l.bf16 %v2023_v53  ;;  %1853 = vmatprep.mubr.msk.f32.mxu0 %vm2596_vm6, %v2597_v41  ;;  %1860 = vmatprep.mubr.msk.f32.mxu1 %vm2596_vm6, %v2597_v41 }
  0xdf   :  { %v3056_v50 = vsel %vm1136_vm3, %v1134_v0, %v526_v11  ;;  %v2028_v26 = vpop.permute.xlu0 %2027  ;;  %2312 = vrot.lane.b32.xlu1 %v2721_v48, %s2592_s30 }
  0xe0   :  { %v527_v13 = vsel %vm407_vm1, %v2024_v30, %v2025_v14  ;;  %v2030_v51 = vunpack.i.h.bf16 %v2028_v26  ;;  %v2029_v57 = vunpack.i.l.bf16 %v2028_v26  ;;  %v1140_v30 = vsel %vm1136_vm3, %v1131_v58, %v523_v59 }
  0xe1   :  { %v3067_v0 = vsel %vm1136_vm3, %v1135_v28, %v527_v13  ;;  %2317 = vrot.lane.b32.xlu0 %v2729_v52, %s2592_s30  ;;  %v2033_v60 = vpop.permute.xlu1 %2032 }
  0xe2   :  { %v569_v10 = vsel %vm568_vm4, %v2029_v57, %v2030_v51  ;;  %v2035_v61 = vunpack.i.h.bf16 %v2033_v60  ;;  %v2034_v49 = vunpack.i.l.bf16 %v2033_v60 }
  0xe3   :  { %v1146_v28 = vsel %vm1145_vm5, %v1137_v46, %v569_v10  ;;  %v2038_v22 = vpop.permute.xlu0 %2037  ;;  %2322 = vrot.lane.b32.xlu1 %v2719_v47, %s2594_s5 }
  0xe4   :  { %v570_v54 = vsel %vm568_vm4, %v2034_v49, %v2035_v61  ;;  %v2040_v1 = vunpack.i.h.bf16 %v2038_v22  ;;  %v2039_v2 = vunpack.i.l.bf16 %v2038_v22 }
  0xe5   :  { %v1147_v62 = vsel %vm1145_vm5, %v1138_v25, %v570_v54  ;;  %2327 = vrot.lane.b32.xlu0 %v2787_v23, %s2594_s5  ;;  %v2043_v3 = vpop.permute.xlu1 %2042 }
  0xe6   :  { %v571_v7 = vsel %vm568_vm4, %v2039_v2, %v2040_v1  ;;  %v2045_v53 = vunpack.i.h.bf16 %v2043_v3  ;;  %v2044_v47 = vunpack.i.l.bf16 %v2043_v3 }
  0xe7   :  { %v1148_v11 = vsel %vm1145_vm5, %v1139_v45, %v571_v7  ;;  %v2048_v14 = vpop.permute.xlu0 %2047  ;;  %2332 = vrot.lane.b32.xlu1 %v2331_v43, %s2590_s26 }
  0xe8   :  { %v572_v23 = vsel %vm568_vm4, %v2044_v47, %v2045_v53  ;;  %v2050_v5 = vunpack.i.h.bf16 %v2048_v14  ;;  %v2049_v37 = vunpack.i.l.bf16 %v2048_v14 }
  0xe9   :  { %v1149_v15 = vsel %vm1145_vm5, %v1140_v30, %v572_v23  ;;  %2337 = vrot.lane.b32.xlu0 %v2336_v44, %s2590_s26  ;;  %v2053_v16 = vpop.permute.xlu1 %2052 }
  0xea   :  { %v573_v17 = vsel %vm568_vm4, %v2049_v37, %v2050_v5  ;;  %v2055_v43 = vunpack.i.h.bf16 %v2053_v16  ;;  %v2054_v26 = vunpack.i.l.bf16 %v2053_v16 }
  0xeb   :  { %v1150_v46 = vsel %vm1145_vm5, %v3038_v21, %v573_v17  ;;  %v2058_v13 = vpop.permute.xlu0 %2057  ;;  %2342 = vrot.lane.b32.xlu1 %v2815_v35, %s2592_s30 }
  0xec   :  { %v574_v51 = vsel %vm568_vm4, %v2054_v26, %v2055_v43  ;;  %v2060_v57 = vunpack.i.h.bf16 %v2058_v13  ;;  %v2059_v63 = vunpack.i.l.bf16 %v2058_v13 }
  0xed   :  { %v1151_v18 = vsel %vm1145_vm5, %v3047_v9, %v574_v51  ;;  %2347 = vrot.lane.b32.xlu0 %v2821_v36, %s2592_s30  ;;  %v2063_v19 = vpop.permute.xlu1 %2062 }
  0xee   :  { %v575_v44 = vsel %vm568_vm4, %v2059_v63, %v2060_v57  ;;  %v2065_v42 = vunpack.i.h.bf16 %v2063_v19  ;;  %v2064_v12 = vunpack.i.l.bf16 %v2063_v19 }
  0xef   :  { %v1152_v21 = vsel %vm1145_vm5, %v3056_v50, %v575_v44  ;;  %v2068_v60 = vpop.permute.xlu0 %2067  ;;  %2352 = vrot.lane.b32.xlu1 %v2807_v33, %s2594_s5 }
  0xf0   :  { %v576_v40 = vsel %vm568_vm4, %v2064_v12, %v2065_v42  ;;  %v2070_v10 = vunpack.i.h.bf16 %v2068_v60  ;;  %v2069_v61 = vunpack.i.l.bf16 %v2068_v60 }
  0xf1   :  { %v1153_v9 = vsel %vm1145_vm5, %v3067_v0, %v576_v40  ;;  %2357 = vrot.lane.b32.xlu0 %v2811_v34, %s2594_s5  ;;  %v2073_v49 = vpop.permute.xlu1 %2072 }
  0xf2   :  { %v617_v38 = vsel %vm568_vm4, %v2069_v61, %v2070_v10  ;;  %v2075_v4 = vunpack.i.h.bf16 %v2073_v49  ;;  %v2074_v50 = vunpack.i.l.bf16 %v2073_v49 }
  0xf3   :  { %v2078_v29 = vpop.permute.xlu0 %2077  ;;  %2362 = vrot.lane.b32.xlu1 %v2721_v48, %s2593_s4  ;;  %v3130_v33 = vsel %vm1154_vm7, %v1146_v28, %v617_v38 }
  0xf4   :  { %v618_v22 = vsel %vm568_vm4, %v2074_v50, %v2075_v4  ;;  %v2080_v54 = vunpack.i.h.bf16 %v2078_v29  ;;  %v2079_v25 = vunpack.i.l.bf16 %v2078_v29  ;;  %v2426_v29 = vpack.i.bf16 %v2759_v6, %v2793_v27 }
  0xf5   :  { %2367 = vrot.lane.b32.xlu0 %v2729_v52, %s2593_s4  ;;  %v2083_v34 = vpop.permute.xlu1 %2082  ;;  %v3136_v0 = vsel %vm1154_vm7, %v1147_v62, %v618_v22 }
  0xf6   :  { %v619_v1 = vsel %vm568_vm4, %v2079_v25, %v2080_v54  ;;  %v2085_v2 = vunpack.i.h.bf16 %v2083_v34  ;;  %v2084_v45 = vunpack.i.l.bf16 %v2083_v34 }
  0xf7   :  { %v1157_v59 = vsel %vm1154_vm7, %v1148_v11, %v619_v1  ;;  %v2088_v3 = vpop.permute.xlu0 %2087  ;;  %2372 = vrot.lane.b32.xlu1 %v2801_v31, %s2591_s27 }
  0xf8   :  { %v620_v28 = vsel %vm568_vm4, %v2084_v45, %v2085_v2  ;;  %v2090_v7 = vunpack.i.h.bf16 %v2088_v3  ;;  %v2089_v53 = vunpack.i.l.bf16 %v2088_v3 }
  0xf9   :  { %v1158_v47 = vsel %vm1154_vm7, %v1149_v15, %v620_v28  ;;  %2377 = vrot.lane.b32.xlu0 %v2803_v32, %s2591_s27  ;;  %v2093_v62 = vpop.permute.xlu1 %2092 }
  0xfa   :  { %v621_v58 = vsel %vm568_vm4, %v2089_v53, %v2090_v7  ;;  %v2095_v14 = vunpack.i.h.bf16 %v2093_v62  ;;  %v2094_v30 = vunpack.i.l.bf16 %v2093_v62 }
  0xfb   :  { %v1159_v11 = vsel %vm1154_vm7, %v1150_v46, %v621_v58  ;;  %v2098_v23 = vpop.permute.xlu0 %2097  ;;  %2382 = vrot.lane.b32.xlu1 %v2825_v39, %s2591_s27 }
  0xfc   :  { %v622_v5 = vsel %vm568_vm4, %v2094_v30, %v2095_v14  ;;  %v2100_v37 = vunpack.i.h.bf16 %v2098_v23  ;;  %v2099_v16 = vunpack.i.l.bf16 %v2098_v23 }
  0xfd   :  { %v1160_v15 = vsel %vm1154_vm7, %v1151_v18, %v622_v5  ;;  %2387 = vrot.lane.b32.xlu0 %v2856_v55, %s2591_s27  ;;  %v2103_v17 = vpop.permute.xlu1 %2102 }
  0xfe   :  { %v623_v43 = vsel %vm568_vm4, %v2099_v16, %v2100_v37  ;;  %v2105_v26 = vunpack.i.h.bf16 %v2103_v17  ;;  %v2104_v13 = vunpack.i.l.bf16 %v2103_v17 }
  0xff   :  { %v3156_v46 = vsel %vm1154_vm7, %v1152_v21, %v623_v43  ;;  %v3158_v51 = vpop.permute.xlu0 %2107  ;;  %2392 = vrot.lane.b32.xlu1 %v2815_v35, %s2593_s4 }
 0x100   :  { %v624_v57 = vsel %vm568_vm4, %v2104_v13, %v2105_v26  ;;  %v2110_v62 = vunpack.i.h.bf16 %v3158_v51  ;;  %v2109_v58 = vunpack.i.l.bf16 %v3158_v51 }
 0x101   :  { %v3164_v63 = vsel %vm1154_vm7, %v1153_v9, %v624_v57  ;;  %2397 = vrot.lane.b32.xlu0 %v2821_v36, %s2593_s4  ;;  %v3168_v18 = vpop.permute.xlu1 %2112 }
 0x102   :  { %v666_v17 = vsel %vm665_vm8, %v2109_v58, %v2110_v62  ;;  %v2115_v43 = vunpack.i.h.bf16 %v3168_v18 }
 0x103   :  { %v2118_v19 = vpop.permute.xlu0 %2117  ;;  %2402 = vrot.lane.b32.xlu1 %v2801_v31, %s2592_s30 }
 0x104   :  { %v2120_v44 = vunpack.i.h.bf16 %v2118_v19  ;;  %v2119_v42 = vunpack.i.l.bf16 %v2118_v19 }
 0x105   :  { %2407 = vrot.lane.b32.xlu0 %v2803_v32, %s2592_s30  ;;  %v2123_v12 = vpop.permute.xlu1 %2122 }
 0x106   :  { %v668_v21 = vsel %vm665_vm8, %v2119_v42, %v2120_v44  ;;  %v2125_v60 = vunpack.i.h.bf16 %v2123_v12  ;;  %v2124_v40 = vunpack.i.l.bf16 %v2123_v12  ;;  %v2114_v12 = vunpack.i.l.bf16 %v3168_v18 }
 0x107   :  { %v3176_v10 = vsel %vm1163_vm9, %v1157_v59, %v668_v21  ;;  %v2128_v61 = vpop.permute.xlu0 %2127  ;;  %2412 = vrot.lane.b32.xlu1 %v2721_v48, %s2594_s5 }
 0x108   :  { %v669_v9 = vsel %vm665_vm8, %v2124_v40, %v2125_v60  ;;  %v2130_v49 = vunpack.i.h.bf16 %v2128_v61  ;;  %v2129_v38 = vunpack.i.l.bf16 %v2128_v61 }
 0x109   :  { %v3182_v4 = vsel %vm1163_vm9, %v1158_v47, %v669_v9  ;;  %2417 = vrot.lane.b32.xlu0 %v2729_v52, %s2594_s5  ;;  %v2133_v50 = vpop.permute.xlu1 %2132 }
 0x10a   :  { %v670_v22 = vsel %vm665_vm8, %v2129_v38, %v2130_v49  ;;  %v2135_v54 = vunpack.i.h.bf16 %v2133_v50  ;;  %v2134_v25 = vunpack.i.l.bf16 %v2133_v50 }
 0x10b   :  { %v3190_v48 = vsel %vm1163_vm9, %v1159_v11, %v670_v22  ;;  %v3192_v34 = vpop.permute.xlu0 %2137  ;;  %2422 = vrot.lane.b32.xlu1 %v2421_v8, %s2590_s26 }
 0x10c   :  { %v671_v52 = vsel %vm665_vm8, %v2134_v25, %v2135_v54  ;;  %v2140_v21 = vunpack.i.h.bf16 %v3192_v34 }
 0x10d   :  { %v3200_v1 = vsel %vm1163_vm9, %v1160_v15, %v671_v52  ;;  %2427 = vrot.lane.b32.xlu0 %v2426_v29, %s2590_s26  ;;  %v2143_v6 = vpop.permute.xlu1 %2142 }
 0x10e   :  { %v2145_v30 = vunpack.i.h.bf16 %v2143_v6  ;;  %v2144_v11 = vunpack.i.l.bf16 %v2143_v6 }
 0x10f   :  { %v2148_v27 = vpop.permute.xlu0 %2147  ;;  %2432 = vrot.lane.b32.xlu1 %v2825_v39, %s2592_s30 }
 0x110   :  { %v2150_v5 = vunpack.i.h.bf16 %v2148_v27  ;;  %v2149_v37 = vunpack.i.l.bf16 %v2148_v27  ;;  %v763_v60 = vsel %vm762_vm10, %v2144_v11, %v2145_v30 }
 0x111   :  { %2437 = vrot.lane.b32.xlu0 %v2856_v55, %s2592_s30  ;;  %v2153_v2 = vpop.permute.xlu1 %2152 }
 0x112   :  { %v2154_v23 = vunpack.i.l.bf16 %v2153_v2  ;;  %v764_v61 = vsel %vm762_vm10, %v2149_v37, %v2150_v5 }
 0x113   :  { %v2158_v45 = vpop.permute.xlu0 %2157  ;;  %2442 = vrot.lane.b32.xlu1 %v2815_v35, %s2594_s5 }
 0x114   :  { %v2160_v16 = vunpack.i.h.bf16 %v2158_v45  ;;  %v2159_v15 = vunpack.i.l.bf16 %v2158_v45 }
 0x115   :  { %2447 = vrot.lane.b32.xlu0 %v2821_v36, %s2594_s5  ;;  %v3211_v20 = vpop.permute.xlu1 %2162 }
 0x116   :  { %v2165_v26 = vunpack.i.h.bf16 %v3211_v20  ;;  %v2164_v13 = vunpack.i.l.bf16 %v3211_v20  ;;  %v812_v9 = vsel %vm762_vm10, %v2159_v15, %v2160_v16 }
 0x117   :  { %v3213_v24 = vpop.permute.xlu0 %2167  ;;  %2452 = vrot.lane.b32.xlu1 %v2801_v31, %s2593_s4 }
 0x118   :  { %v2170_v51 = vunpack.i.h.bf16 %v3213_v24  ;;  %v2169_v57 = vunpack.i.l.bf16 %v3213_v24  ;;  %v860_v52 = vsel %vm859_vm11, %v2164_v13, %v2165_v26 }
 0x119   :  { %2457 = vrot.lane.b32.xlu0 %v2803_v32, %s2593_s4  ;;  %v3219_v8 = vpop.permute.xlu1 %2172 }
 0x11a   :  { %v2175_v19 = vunpack.i.h.bf16 %v3219_v8  ;;  %v2174_v44 = vunpack.i.l.bf16 %v3219_v8  ;;  %v861_v6 = vsel %vm859_vm11, %v2169_v57, %v2170_v51 }
 0x11b   :  { %v3221_v59 = vpop.permute.xlu0 %2177  ;;  %2462 = vrot.lane.b32.xlu1 %v2825_v39, %s2593_s4 }
 0x11c   :  { %v2180_v29 = vunpack.i.h.bf16 %v3221_v59  ;;  %v2179_v22 = vunpack.i.l.bf16 %v3221_v59  ;;  %v908_v27 = vsel %vm859_vm11, %v2174_v44, %v2175_v19  ;;  %v1182_v59 = vsel %vm1118_vm0, %v764_v61, %v812_v9 }
 0x11d   :  { %2467 = vrot.lane.b32.xlu0 %v2856_v55, %s2593_s4  ;;  %v3227_v35 = vpop.permute.xlu1 %2182  ;;  %v1164_v44 = vsel %vm1163_vm9, %v3130_v33, %v666_v17 }
 0x11e   :  { %v2185_v49 = vunpack.i.h.bf16 %v3227_v35  ;;  %v2184_v38 = vunpack.i.l.bf16 %v3227_v35  ;;  %v909_v11 = vsel %vm859_vm11, %v2179_v22, %v2180_v29 }
 0x11f   :  { %v3229_v36 = vpop.permute.xlu0 %2187  ;;  %2472 = vrot.lane.b32.xlu1 %v2803_v32, %s2590_s26 }
 0x120   :  { %v2190_v45 = vunpack.i.h.bf16 %v3229_v36  ;;  %v2189_v20 = vunpack.i.l.bf16 %v3229_v36  ;;  %v957_v35 = vsel %vm956_vm12, %v2184_v38, %v2185_v49  ;;  %v1190_v36 = vsel %vm1127_vm2, %v1182_v59, %v861_v6 }
 0x121   :  { %2477 = vrot.lane.b32.xlu0 %v2801_v31, %s2594_s5  ;;  %v3235_v3 = vpop.permute.xlu1 %2192  ;;  %v1198_v51 = vsel %vm1136_vm3, %v1190_v36, %v909_v11  ;;  %v667_v49 = vsel %vm665_vm8, %v2114_v12, %v2115_v43 }
 0x122   :  { %v2195_v36 = vunpack.i.h.bf16 %v3235_v3 }
 0x123   :  { %v3237_v28 = vpop.permute.xlu0 %2197  ;;  %2482 = vrot.lane.b32.xlu1 %v2803_v32, %s2594_s5 }
 0x125   :  { %2487 = vrot.lane.b32.xlu0 %v2825_v39, %s2590_s26  ;;  %v3243_v7 = vpop.permute.xlu1 %2202 }
 0x127   :  { %v3245_v53 = vpop.permute.xlu0 %2207  ;;  %2492 = vrot.lane.b32.xlu1 %v2856_v55, %s2590_s26 }
 0x129   :  { %2497 = vrot.lane.b32.xlu0 %v2825_v39, %s2594_s5  ;;  %v2213_v31 = vpop.permute.xlu1 %2212  ;;  %v2155_v39 = vunpack.i.h.bf16 %v2153_v2 }
 0x12a   :  { %v2215_v18 = vunpack.i.h.bf16 %v2213_v31  ;;  %v2214_v54 = vunpack.i.l.bf16 %v2213_v31 }
 0x12b   :  { %v3251_v47 = vpop.permute.xlu0 %2217  ;;  %2502 = vrot.lane.b32.xlu1 %v2856_v55, %s2594_s5  ;;  %v811_v40 = vsel %vm762_vm10, %v2154_v23, %v2155_v39 }
 0x12c   :  { %v1181_v25 = vsel %vm1118_vm0, %v763_v60, %v811_v40  ;;  %v2220_v31 = vunpack.i.h.bf16 %v3251_v47  ;;  %v2219_v62 = vunpack.i.l.bf16 %v3251_v47  ;;  %v1005_v39 = vsel %vm956_vm12, %v2214_v54, %v2215_v18 }
 0x12d   :  { %v3255_v32 = vpop.permute.xlu1 %2222  ;;  %v1189_v30 = vsel %vm1127_vm2, %v1181_v25, %v860_v52  ;;  %v958_v47 = vsel %vm956_vm12, %v2189_v20, %v2190_v45 }
 0x12e   :  { %v1197_v5 = vsel %vm1136_vm3, %v1189_v30, %v908_v27  ;;  %v1006_v57 = vsel %vm956_vm12, %v2219_v62, %v2220_v31  ;;  %v1206_v38 = vsel %vm1145_vm5, %v1198_v51, %v958_v47  ;;  %v1165_v27 = vsel %vm1163_vm9, %v3136_v0, %v667_v49 }
 0x12f   :  { %v3259_v14 = vpop.permute.xlu0 %2227  ;;  %v1214_v43 = vsel %vm1154_vm7, %v1206_v38, %v1006_v57  ;;  %v2210_v47 = vunpack.i.h.bf16 %v3245_v53  ;;  %v2199_v51 = vunpack.i.l.bf16 %v3237_v28  ;;  %v2225_v57 = vunpack.i.h.bf16 %v3255_v32 }
 0x131   :  { %v2233_v55 = vpop.permute.xlu1 %2232 }
 0x132   :  { %v2235_v24 = vunpack.i.h.bf16 %v2233_v55  ;;  %v2234_v8 = vunpack.i.l.bf16 %v2233_v55  ;;  %v1205_v55 = vsel %vm1145_vm5, %v1197_v5, %v957_v35  ;;  %v3329_v35 = vld [vmem:[#allocation2] sm:$0xff]  ;;  %v2194_v5 = vunpack.i.l.bf16 %v3235_v3 }
 0x133   :  { %v2238_v42 = vpop.permute.xlu0 %2237  ;;  %v2230_v3 = vunpack.i.h.bf16 %v3259_v14 }
 0x134   :  { %v2240_v37 = vunpack.i.h.bf16 %v2238_v42  ;;  %v2239_v16 = vunpack.i.l.bf16 %v2238_v42  ;;  %v1054_v26 = vsel %vm1053_vm13, %v2234_v8, %v2235_v24  ;;  %v1213_v42 = vsel %vm1154_vm7, %v1205_v55, %v1005_v39 }
 0x135   :  { %v2243_v50 = vpop.permute.xlu1 %2242  ;;  %v1221_v18 = vsel %vm1163_vm9, %v1213_v42, %v1054_v26  ;;  %v2204_v55 = vunpack.i.l.bf16 %v3243_v7  ;;  %v2209_v26 = vunpack.i.l.bf16 %v3245_v53  ;;  %v2229_v42 = vunpack.i.l.bf16 %v3259_v14 }
 0x136   :  { %v2244_v23 = vunpack.i.l.bf16 %v2243_v50  ;;  %v2245_v60 = vunpack.i.h.bf16 %v2243_v50  ;;  %v1055_v29 = vsel %vm1053_vm13, %v2239_v16, %v2240_v37  ;;  %v2205_v16 = vunpack.i.h.bf16 %v3243_v7 }
 0x137   :  { %v3283_v2 = vpop.permute.xlu0 %2247  ;;  %v1222_v45 = vsel %vm1163_vm9, %v1214_v43, %v1055_v29  ;;  %v765_v53 = vsel %vm762_vm10, %v2194_v5, %v2195_v36 }
 0x138   :  { %v2249_v13 = vunpack.i.l.bf16 %v3283_v2  ;;  %v714_v9 = vsel %vm665_vm8, %v2140_v21, %v2244_v23  ;;  %v2250_v5 = vunpack.i.h.bf16 %v3283_v2 }
 0x139   :  { %v3291_v58 = vpop.permute.xlu1 %2252  ;;  %v1173_v52 = vsel %vm1172_vm14, %v1164_v44, %v714_v9 }
 0x13a   :  { %v715_v17 = vsel %vm665_vm8, %v2245_v60, %v2249_v13  ;;  %v2200_v13 = vunpack.i.h.bf16 %v3237_v28  ;;  %v2255_v60 = vunpack.i.h.bf16 %v3291_v58  ;;  %v2254_v7 = vunpack.i.l.bf16 %v3291_v58 }
 0x13b   :  { %v3298_v15 = vpop.permute.xlu0 %2257  ;;  %v1174_v24 = vsel %vm1172_vm14, %v1165_v27, %v715_v17  ;;  %v814_v28 = vsel %vm762_vm10, %v2209_v26, %v2210_v47 }
 0x13c   :  { %v766_v9 = vsel %vm762_vm10, %v2199_v51, %v2200_v13  ;;  %v2260_v29 = vunpack.i.h.bf16 %v3298_v15  ;;  %v2259_v58 = vunpack.i.l.bf16 %v3298_v15  ;;  %v910_v17 = vsel %vm859_vm11, %v2254_v7, %v2255_v60 }
 0x13d   :  { %v2263_v19 = vpop.permute.xlu1 %2262 }
 0x13e   :  { %v2265_v40 = vunpack.i.h.bf16 %v2263_v19  ;;  %v2264_v61 = vunpack.i.l.bf16 %v2263_v19  ;;  %v2224_v19 = vunpack.i.l.bf16 %v3255_v32 }
 0x13f   :  { %v2268_v22 = vpop.permute.xlu0 %2267 }
 0x140   :  { %v2270_v54 = vunpack.i.h.bf16 %v2268_v22  ;;  %v2269_v25 = vunpack.i.l.bf16 %v2268_v22  ;;  %v1102_v33 = vsel %vm1053_vm13, %v2264_v61, %v2265_v40  ;;  %v813_v61 = vsel %vm762_vm10, %v2204_v55, %v2205_v16 }
 0x141   :  { %v3316_v50 = vpop.permute.xlu1 %2272  ;;  %v1229_v21 = vsel %vm1172_vm14, %v1221_v18, %v1102_v33  ;;  %v862_v32 = vsel %vm859_vm11, %v2224_v19, %v2225_v57  ;;  %v863_v33 = vsel %vm859_vm11, %v2229_v42, %v2230_v3 }
 0x142   :  { %v1906_v12 = vpack.c.bf16 %v1229_v21, %v1173_v52  ;;  %v1103_v6 = vsel %vm1053_vm13, %v2269_v25, %v2270_v54  ;;  %v2275_v49 = vunpack.i.h.bf16 %v3316_v50  ;;  %v2274_v38 = vunpack.i.l.bf16 %v3316_v50 }
 0x143   :  { %v3325_v20 = vpop.permute.xlu0 %2277  ;;  %v1230_v8 = vsel %vm1172_vm14, %v1222_v45, %v1103_v6  ;;  %v1183_v54 = vsel %vm1118_vm0, %v765_v53, %v813_v61  ;;  %v1184_v25 = vsel %vm1118_vm0, %v766_v9, %v814_v28 }
 0x144   :  { %1907 = vmatpush3.bf16.msra.mxu0 %v1906_v12  ;;  %v1909_v59 = vpack.c.bf16 %v1230_v8, %v1174_v24  ;;  %v2280_v21 = vunpack.i.h.bf16 %v3325_v20  ;;  %v2279_v50 = vunpack.i.l.bf16 %v3325_v20  ;;  %v1191_v15 = vsel %vm1127_vm2, %v1183_v54, %v862_v32 }
 0x145   :  { %v3331_v31 = vpop.permute.xlu1 %2282  ;;  %1911 = vmatprep.subr.bf16.mxu0 %v2595_v56  ;;  %v959_v6 = vsel %vm956_vm12, %v2274_v38, %v2275_v49  ;;  %v1192_v8 = vsel %vm1127_vm2, %v1184_v25, %v863_v33  ;;  %v1199_v20 = vsel %vm1136_vm3, %v1191_v15, %v910_v17 }
 0x146   :  { %1910 = vmatpush3.bf16.msra.mxu1 %v1909_v59  ;;  %v911_v59 = vsel %vm859_vm11, %v2259_v58, %v2260_v29  ;;  %v1207_v26 = vsel %vm1145_vm5, %v1199_v20, %v959_v6 }
 0x147   :  { %v3334_v62 = vpop.permute.xlu0 %2287  ;;  %1854 = vmatmul.mubr.msk.f32.vlgmr.msra.gmra.mrb[0].mxu0 %vm1238_vm15, %v3329_v35  ;;  %1914 = vmatprep.subr.bf16.mxu1 %v2595_v56  ;;  %v1200_v57 = vsel %vm1136_vm3, %v1192_v8, %v911_v59 }
 0x148   :  { %1867 = vmatprep.mubr.msk.f32.mxu0 %vm2596_vm6, %v2597_v41  ;;  %v2290_v20 = vunpack.i.h.bf16 %v3334_v62 }
 0x149   :  { %v3341_v0 = vpop.permute.xlu1 %2292  ;;  %1861 = vmatmul.mubr.msk.f32.vlgmr.msra.gmra.mrb[0].mxu1 %vm1238_vm15, %v3329_v35 }
 0x14a   :  { %1874 = vmatprep.mubr.msk.f32.mxu1 %vm2596_vm6, %v2597_v41  ;;  %v2294_v8 = vunpack.i.l.bf16 %v3341_v0 }
 0x14b   :  { %v3347_v30 = vpop.permute.xlu0 %2297 }
 0x14c   :  { %v2300_v59 = vunpack.i.h.bf16 %v3347_v30 }
 0x14d   :  { %v2303_v11 = vpop.permute.xlu1 %2302 }
 0x14e   :  { %v2305_v22 = vunpack.i.h.bf16 %v2303_v11  ;;  %v2304_v18 = vunpack.i.l.bf16 %v2303_v11 }
 0x14f   :  { %v2308_v39 = vpop.permute.xlu0 %2307 }
 0x150   :  { %v2310_v27 = vunpack.i.h.bf16 %v2308_v39  ;;  %v2309_v45 = vunpack.i.l.bf16 %v2308_v39  ;;  %v1007_v11 = vsel %vm956_vm12, %v2304_v18, %v2305_v22  ;;  %v960_v39 = vsel %vm956_vm12, %v2279_v50, %v2280_v21 }
 0x151   :  { %v3349_v23 = vpop.permute.xlu1 %2312  ;;  %v1215_v19 = vsel %vm1154_vm7, %v1207_v26, %v1007_v11  ;;  %v2299_v11 = vunpack.i.l.bf16 %v3347_v30 }
 0x152   :  { %v1008_v2 = vsel %vm956_vm12, %v2309_v45, %v2310_v27  ;;  %v2295_v45 = vunpack.i.h.bf16 %v3341_v0  ;;  %v2315_v26 = vunpack.i.h.bf16 %v3349_v23 }
 0x153   :  { %v3353_v37 = vpop.permute.xlu0 %2317 }
 0x154   :  { %v2320_v0 = vunpack.i.h.bf16 %v3353_v37  ;;  %v815_v30 = vsel %vm762_vm10, %v2294_v8, %v2295_v45 }
 0x155   :  { %v2323_v44 = vpop.permute.xlu1 %2322 }
 0x156   :  { %v2325_v43 = vunpack.i.h.bf16 %v2323_v44  ;;  %v2324_v12 = vunpack.i.l.bf16 %v2323_v44 }
 0x157   :  { %v2328_v40 = vpop.permute.xlu0 %2327 }
 0x158   :  { %v2330_v16 = vunpack.i.h.bf16 %v2328_v40  ;;  %v2329_v55 = vunpack.i.l.bf16 %v2328_v40  ;;  %v1056_v13 = vsel %vm1053_vm13, %v2324_v12, %v2325_v43  ;;  %v1208_v40 = vsel %vm1145_vm5, %v1200_v57, %v960_v39 }
 0x159   :  { %v2333_v14 = vpop.permute.xlu1 %2332  ;;  %v1223_v53 = vsel %vm1163_vm9, %v1215_v19, %v1056_v13  ;;  %v1216_v29 = vsel %vm1154_vm7, %v1208_v40, %v1008_v2  ;;  %v2314_v39 = vunpack.i.l.bf16 %v3349_v23  ;;  %v2319_v13 = vunpack.i.l.bf16 %v3353_v37 }
 0x15a   :  { %v2334_v36 = vunpack.i.l.bf16 %v2333_v14  ;;  %v2335_v3 = vunpack.i.h.bf16 %v2333_v14  ;;  %v1057_v61 = vsel %vm1053_vm13, %v2329_v55, %v2330_v16  ;;  %v2289_v16 = vunpack.i.l.bf16 %v3334_v62 }
 0x15b   :  { %v3380_v52 = vpop.permute.xlu0 %2337  ;;  %v1224_v18 = vsel %vm1163_vm9, %v1216_v29, %v1057_v61  ;;  %v816_v57 = vsel %vm762_vm10, %v2299_v11, %v2300_v59  ;;  %v865_v37 = vsel %vm859_vm11, %v2319_v13, %v2320_v0 }
 0x15c   :  { %v2339_v51 = vunpack.i.l.bf16 %v3380_v52  ;;  %v716_v42 = vsel %vm665_vm8, %v2250_v5, %v2334_v36  ;;  %v2285_v36 = vunpack.i.h.bf16 %v3331_v31  ;;  %v2284_v5 = vunpack.i.l.bf16 %v3331_v31 }
 0x15d   :  { %v3386_v24 = vpop.permute.xlu1 %2342  ;;  %v1175_v58 = vsel %vm1172_vm14, %v3176_v10, %v716_v42  ;;  %v2139_v31 = vunpack.i.l.bf16 %v3192_v34  ;;  %v768_v23 = vsel %vm762_vm10, %v2289_v16, %v2290_v20 }
 0x15e   :  { %v717_v9 = vsel %vm665_vm8, %v2335_v3, %v2339_v51  ;;  %v2345_v19 = vunpack.i.h.bf16 %v3386_v24  ;;  %v2344_v62 = vunpack.i.l.bf16 %v3386_v24  ;;  %v864_v3 = vsel %vm859_vm11, %v2314_v39, %v2315_v26 }
 0x15f   :  { %v3393_v47 = vpop.permute.xlu0 %2347  ;;  %v1176_v17 = vsel %vm1172_vm14, %v3182_v4, %v717_v9 }
 0x160   :  { %v2350_v24 = vunpack.i.h.bf16 %v3393_v47 }
 0x161   :  { %v2353_v44 = vpop.permute.xlu1 %2352 }
 0x162   :  { %v2355_v60 = vunpack.i.h.bf16 %v2353_v44  ;;  %v2354_v7 = vunpack.i.l.bf16 %v2353_v44  ;;  %v767_v44 = vsel %vm762_vm10, %v2284_v5, %v2285_v36 }
 0x163   :  { %v2358_v28 = vpop.permute.xlu0 %2357  ;;  %v1185_v42 = vsel %vm1118_vm0, %v767_v44, %v815_v30 }
 0x164   :  { %v1104_v32 = vsel %vm1053_vm13, %v2354_v7, %v2355_v60  ;;  %v2360_v49 = vunpack.i.h.bf16 %v2358_v28  ;;  %v2359_v38 = vunpack.i.l.bf16 %v2358_v28  ;;  %v1186_v60 = vsel %vm1118_vm0, %v768_v23, %v816_v57 }
 0x165   :  { %v3409_v14 = vpop.permute.xlu1 %2362  ;;  %v1231_v22 = vsel %vm1172_vm14, %v1223_v53, %v1104_v32  ;;  %v2349_v53 = vunpack.i.l.bf16 %v3393_v47  ;;  %v1193_v9 = vsel %vm1127_vm2, %v1185_v42, %v864_v3  ;;  %v1194_v32 = vsel %vm1127_vm2, %v1186_v60, %v865_v37 }
 0x166   :  { %v1105_v54 = vsel %vm1053_vm13, %v2359_v38, %v2360_v49  ;;  %v1912_v25 = vpack.c.bf16 %v1231_v22, %v1175_v58  ;;  %v2365_v7 = vunpack.i.h.bf16 %v3409_v14  ;;  %v2364_v34 = vunpack.i.l.bf16 %v3409_v14 }
 0x167   :  { %v3416_v33 = vpop.permute.xlu0 %2367  ;;  %v1232_v21 = vsel %vm1172_vm14, %v1224_v18, %v1105_v54  ;;  %v912_v49 = vsel %vm859_vm11, %v2344_v62, %v2345_v19  ;;  %v2340_v54 = vunpack.i.h.bf16 %v3380_v52 }
 0x168   :  { %1913 = vmatpush3.bf16.msra.mxu0 %v1912_v25  ;;  %v1915_v50 = vpack.c.bf16 %v1232_v21, %v1176_v17  ;;  %v2370_v38 = vunpack.i.h.bf16 %v3416_v33  ;;  %v2369_v58 = vunpack.i.l.bf16 %v3416_v33  ;;  %v961_v47 = vsel %vm956_vm12, %v2364_v34, %v2365_v7 }
 0x169   :  { %v3421_v43 = vpop.permute.xlu1 %2372  ;;  %1917 = vmatprep.subr.bf16.mxu0 %v2595_v56  ;;  %v1201_v8 = vsel %vm1136_vm3, %v1193_v9, %v912_v49 }
 0x16a   :  { %1916 = vmatpush3.bf16.msra.mxu1 %v1915_v50  ;;  %v913_v50 = vsel %vm859_vm11, %v2349_v53, %v2350_v24  ;;  %v962_v5 = vsel %vm956_vm12, %v2369_v58, %v2370_v38  ;;  %v2375_v38 = vunpack.i.h.bf16 %v3421_v43 }
 0x16b   :  { %v3424_v10 = vpop.permute.xlu0 %2377  ;;  %1868 = vmatmul.mubr.msk.f32.vlgmr.msra.gmra.mrb[2].mxu0 %vm1238_vm15, %v3329_v35  ;;  %1920 = vmatprep.subr.bf16.mxu1 %v2595_v56  ;;  %v1202_v26 = vsel %vm1136_vm3, %v1194_v32, %v913_v50 }
 0x16c   :  { %1881 = vmatprep.mubr.msk.f32.mxu0 %vm2596_vm6, %v2597_v41 }
 0x16d   :  { %v3431_v4 = vpop.permute.xlu1 %2382  ;;  %1875 = vmatmul.mubr.msk.f32.vlgmr.msra.gmra.mrb[2].mxu1 %vm1238_vm15, %v3329_v35 }
 0x16e   :  { %1888 = vmatprep.mubr.msk.f32.mxu1 %vm2596_vm6, %v2597_v41 }
 0x16f   :  { %v3437_v12 = vpop.permute.xlu0 %2387 }
 0x171   :  { %v2393_v15 = vpop.permute.xlu1 %2392 }
 0x172   :  { %v2395_v61 = vunpack.i.h.bf16 %v2393_v15  ;;  %v2394_v28 = vunpack.i.l.bf16 %v2393_v15 }
 0x173   :  { %v3439_v6 = vpop.permute.xlu0 %2397 }
 0x174   :  { %v2400_v25 = vunpack.i.h.bf16 %v3439_v6  ;;  %v2399_v17 = vunpack.i.l.bf16 %v3439_v6  ;;  %v1009_v15 = vsel %vm956_vm12, %v2394_v28, %v2395_v61  ;;  %v1209_v6 = vsel %vm1145_vm5, %v1201_v8, %v961_v47 }
 0x175   :  { %v3441_v27 = vpop.permute.xlu1 %2402  ;;  %v1217_v39 = vsel %vm1154_vm7, %v1209_v6, %v1009_v15  ;;  %v2385_v61 = vunpack.i.h.bf16 %v3431_v4  ;;  %v2384_v28 = vunpack.i.l.bf16 %v3431_v4  ;;  %v2390_v4 = vunpack.i.h.bf16 %v3437_v12 }
 0x176   :  { %v1010_v0 = vsel %vm956_vm12, %v2399_v17, %v2400_v25  ;;  %v2405_v58 = vunpack.i.h.bf16 %v3441_v27  ;;  %v2380_v47 = vunpack.i.h.bf16 %v3424_v10 }
 0x177   :  { %v3451_v55 = vpop.permute.xlu0 %2407  ;;  %v817_v25 = vsel %vm762_vm10, %v2384_v28, %v2385_v61 }
 0x179   :  { %v2413_v51 = vpop.permute.xlu1 %2412 }
 0x17a   :  { %v2415_v22 = vunpack.i.h.bf16 %v2413_v51  ;;  %v2414_v14 = vunpack.i.l.bf16 %v2413_v51 }
 0x17b   :  { %v2418_v2 = vpop.permute.xlu0 %2417 }
 0x17c   :  { %v2420_v59 = vunpack.i.h.bf16 %v2418_v2  ;;  %v2419_v11 = vunpack.i.l.bf16 %v2418_v2  ;;  %v1058_v20 = vsel %vm1053_vm13, %v2414_v14, %v2415_v22  ;;  %v2404_v22 = vunpack.i.l.bf16 %v3441_v27 }
 0x17d   :  { %v2423_v40 = vpop.permute.xlu1 %2422  ;;  %v1225_v19 = vsel %vm1163_vm9, %v1217_v39, %v1058_v20  ;;  %v2410_v27 = vunpack.i.h.bf16 %v3451_v55 }
 0x17e   :  { %v2424_v45 = vunpack.i.l.bf16 %v2423_v40  ;;  %v2425_v51 = vunpack.i.h.bf16 %v2423_v40  ;;  %v1059_v62 = vsel %vm1053_vm13, %v2419_v11, %v2420_v59 }
 0x17f   :  { %v2428_v29 = vpop.permute.xlu0 %2427 }
 0x180   :  { %v2430_v18 = vunpack.i.h.bf16 %v2428_v29  ;;  %v2429_v16 = vunpack.i.l.bf16 %v2428_v29  ;;  %v2374_v29 = vunpack.i.l.bf16 %v3421_v43  ;;  %v2379_v43 = vunpack.i.l.bf16 %v3424_v10 }
 0x181   :  { %v3481_v21 = vpop.permute.xlu1 %2432  ;;  %v866_v10 = vsel %vm859_vm11, %v2404_v22, %v2405_v58 }
 0x182   :  { %v672_v33 = vsel %vm665_vm8, %v2139_v31, %v2430_v18  ;;  %v1210_v31 = vsel %vm1145_vm5, %v1202_v26, %v962_v5  ;;  %v719_v44 = vsel %vm665_vm8, %v2425_v51, %v2429_v16  ;;  %v2389_v18 = vunpack.i.l.bf16 %v3437_v12 }
 0x183   :  { %v3489_v52 = vsel %vm1163_vm9, %v3156_v46, %v672_v33  ;;  %v3491_v36 = vpop.permute.xlu0 %2437  ;;  %v718_v46 = vsel %vm665_vm8, %v2340_v54, %v2424_v45  ;;  %v1218_v42 = vsel %vm1154_vm7, %v1210_v31, %v1010_v0  ;;  %v1178_v32 = vsel %vm1172_vm14, %v3200_v1, %v719_v44 }
 0x184   :  { %v1177_v7 = vsel %vm1172_vm14, %v3190_v48, %v718_v46  ;;  %v1226_v40 = vsel %vm1163_vm9, %v1218_v42, %v1059_v62  ;;  %v2435_v1 = vunpack.i.h.bf16 %v3481_v21  ;;  %v2434_v54 = vunpack.i.l.bf16 %v3481_v21 }
 0x185   :  { %v2443_v13 = vpop.permute.xlu1 %2442  ;;  %v2409_v12 = vunpack.i.l.bf16 %v3451_v55  ;;  %v769_v21 = vsel %vm762_vm10, %v2374_v29, %v2375_v38  ;;  %v2440_v55 = vunpack.i.h.bf16 %v3491_v36  ;;  %v2439_v59 = vunpack.i.l.bf16 %v3491_v36 }
 0x186   :  { %v2445_v30 = vunpack.i.h.bf16 %v2443_v13  ;;  %v2444_v57 = vunpack.i.l.bf16 %v2443_v13  ;;  %v1187_v33 = vsel %vm1118_vm0, %v769_v21, %v817_v25  ;;  %v914_v8 = vsel %vm859_vm11, %v2434_v54, %v2435_v1 }
 0x187   :  { %v2448_v2 = vpop.permute.xlu0 %2447  ;;  %v770_v20 = vsel %vm762_vm10, %v2379_v43, %v2380_v47  ;;  %v1195_v16 = vsel %vm1127_vm2, %v1187_v33, %v866_v10  ;;  %v867_v26 = vsel %vm859_vm11, %v2409_v12, %v2410_v27  ;;  %v915_v31 = vsel %vm859_vm11, %v2439_v59, %v2440_v55 }
 0x188   :  { %v1106_v23 = vsel %vm1053_vm13, %v2444_v57, %v2445_v30  ;;  %v2450_v3 = vunpack.i.h.bf16 %v2448_v2  ;;  %v2449_v37 = vunpack.i.l.bf16 %v2448_v2  ;;  %v1203_v13 = vsel %vm1136_vm3, %v1195_v16, %v914_v8 }
 0x189   :  { %v2453_v60 = vpop.permute.xlu1 %2452  ;;  %v1233_v34 = vsel %vm1172_vm14, %v1225_v19, %v1106_v23 }
 0x18a   :  { %v1107_v24 = vsel %vm1053_vm13, %v2449_v37, %v2450_v3  ;;  %v1918_v53 = vpack.c.bf16 %v1233_v34, %v1177_v7  ;;  %v2455_v50 = vunpack.i.h.bf16 %v2453_v60  ;;  %v2454_v15 = vunpack.i.l.bf16 %v2453_v60 }
 0x18b   :  { %v3513_v9 = vpop.permute.xlu0 %2457  ;;  %v1234_v49 = vsel %vm1172_vm14, %v1226_v40, %v1107_v24 }
 0x18c   :  { %1919 = vmatpush3.bf16.msra.mxu0 %v1918_v53  ;;  %v1921_v48 = vpack.c.bf16 %v1234_v49, %v1178_v32  ;;  %v963_v39 = vsel %vm956_vm12, %v2454_v15, %v2455_v50  ;;  %v2460_v51 = vunpack.i.h.bf16 %v3513_v9  ;;  %v2459_v36 = vunpack.i.l.bf16 %v3513_v9 }
 0x18d   :  { %v2463_v14 = vpop.permute.xlu1 %2462  ;;  %1923 = vmatprep.subr.bf16.mxu0 %v2595_v56  ;;  %v1211_v19 = vsel %vm1145_vm5, %v1203_v13, %v963_v39 }
 0x18e   :  { %1922 = vmatpush3.bf16.msra.mxu1 %v1921_v48  ;;  %v2465_v11 = vunpack.i.h.bf16 %v2463_v14  ;;  %v2464_v6 = vunpack.i.l.bf16 %v2463_v14  ;;  %v964_v24 = vsel %vm956_vm12, %v2459_v36, %v2460_v51 }
 0x18f   :  { %v2468_v17 = vpop.permute.xlu0 %2467  ;;  %1882 = vmatmul.mubr.msk.f32.vlgmr.msra.gmra.mrb[4].mxu0 %vm1238_vm15, %v3329_v35  ;;  %1926 = vmatprep.subr.bf16.mxu1 %v2595_v56  ;;  %v818_v56 = vsel %vm762_vm10, %v2389_v18, %v2390_v4 }
 0x190   :  { %1895 = vmatprep.mubr.msk.f32.mxu0 %vm2596_vm6, %v2597_v41  ;;  %v1188_v0 = vsel %vm1118_vm0, %v770_v20, %v818_v56  ;;  %v1011_v62 = vsel %vm956_vm12, %v2464_v6, %v2465_v11  ;;  %v2470_v44 = vunpack.i.h.bf16 %v2468_v17  ;;  %v2469_v23 = vunpack.i.l.bf16 %v2468_v17 }
 0x191   :  { %v2473_v45 = vpop.permute.xlu1 %2472  ;;  %1889 = vmatmul.mubr.msk.f32.vlgmr.msra.gmra.mrb[4].mxu1 %vm1238_vm15, %v3329_v35  ;;  %v1196_v57 = vsel %vm1127_vm2, %v1188_v0, %v867_v26  ;;  %v1219_v32 = vsel %vm1154_vm7, %v1211_v19, %v1011_v62 }
 0x192   :  { %1902 = vmatprep.mubr.msk.f32.mxu1 %vm2596_vm6, %v2597_v41  ;;  %v2475_v42 = vunpack.i.h.bf16 %v2473_v45  ;;  %v2474_v60 = vunpack.i.l.bf16 %v2473_v45  ;;  %v1204_v9 = vsel %vm1136_vm3, %v1196_v57, %v915_v31  ;;  %v1012_v48 = vsel %vm956_vm12, %v2469_v23, %v2470_v44 }
 0x193   :  { %v2478_v5 = vpop.permute.xlu0 %2477  ;;  %v1212_v22 = vsel %vm1145_vm5, %v1204_v9, %v964_v24 }
 0x194   :  { %v2480_v46 = vunpack.i.h.bf16 %v2478_v5  ;;  %v2479_v30 = vunpack.i.l.bf16 %v2478_v5  ;;  %v673_v14 = vsel %vm665_vm8, %v2474_v60, %v2475_v42  ;;  %v1220_v17 = vsel %vm1154_vm7, %v1212_v22, %v1012_v48 }
 0x195   :  { %v2483_v41 = vpop.permute.xlu1 %2482  ;;  %v1171_v50 = vsel %vm1163_vm9, %v3164_v63, %v673_v14 }
 0x196   :  { %v2485_v7 = vunpack.i.h.bf16 %v2483_v41  ;;  %v2484_v34 = vunpack.i.l.bf16 %v2483_v41  ;;  %v1060_v53 = vsel %vm1053_vm13, %v2479_v30, %v2480_v46 }
 0x197   :  { %v2488_v2 = vpop.permute.xlu0 %2487  ;;  %v1227_v4 = vsel %vm1163_vm9, %v1219_v32, %v1060_v53 }
 0x198   :  { %v2490_v3 = vunpack.i.h.bf16 %v2488_v2  ;;  %v2489_v37 = vunpack.i.l.bf16 %v2488_v2  ;;  %v1061_v18 = vsel %vm1053_vm13, %v2484_v34, %v2485_v7 }
 0x199   :  { %v2493_v40 = vpop.permute.xlu1 %2492  ;;  %v1228_v15 = vsel %vm1163_vm9, %v1220_v17, %v1061_v18 }
 0x19a   :  { %v2495_v61 = vunpack.i.h.bf16 %v2493_v40  ;;  %v2494_v28 = vunpack.i.l.bf16 %v2493_v40  ;;  %v720_v38 = vsel %vm665_vm8, %v2489_v37, %v2490_v3 }
 0x19b   :  { %v2498_v49 = vpop.permute.xlu0 %2497  ;;  %v1179_v12 = vsel %vm1172_vm14, %v3489_v52, %v720_v38 }
 0x19c   :  { %v2500_v29 = vunpack.i.h.bf16 %v2498_v49  ;;  %v2499_v58 = vunpack.i.l.bf16 %v2498_v49  ;;  %v721_v54 = vsel %vm665_vm8, %v2494_v28, %v2495_v61 }
 0x19d   :  { %v2503_v1 = vpop.permute.xlu1 %2502  ;;  %v1180_v33 = vsel %vm1172_vm14, %v1171_v50, %v721_v54 }
 0x19e   :  { %v1108_v47 = vsel %vm1053_vm13, %v2499_v58, %v2500_v29  ;;  %v2505_v43 = vunpack.i.h.bf16 %v2503_v1  ;;  %v2504_v25 = vunpack.i.l.bf16 %v2503_v1 }
 0x19f   :  { %v1235_v27 = vsel %vm1172_vm14, %v1227_v4, %v1108_v47 }
 0x1a0   :  { %v1109_v21 = vsel %vm1053_vm13, %v2504_v25, %v2505_v43  ;;  %v1924_v10 = vpack.c.bf16 %v1235_v27, %v1179_v12 }
 0x1a1   :  { %v1236_v45 = vsel %vm1172_vm14, %v1228_v15, %v1109_v21 }
 0x1a2   :  { %1925 = vmatpush3.bf16.msra.mxu0 %v1924_v10  ;;  %v1927_v56 = vpack.c.bf16 %v1236_v45, %v1180_v33 }
 0x1a4   :  { %1928 = vmatpush3.bf16.msra.mxu1 %v1927_v56 }
 0x1a5   :  { %1896 = vmatmul.mubr.msk.f32.vlgmr.msra.gmra.mrb[6].mxu0 %vm1238_vm15, %v3329_v35 }
 0x1a7   :  { %1903 = vmatmul.mubr.msk.f32.vlgmr.msra.gmra.mrb[6].mxu1 %vm1238_vm15, %v3329_v35 }
 0x21a   :  { %v1308_v52 = vpop.f32.mrb[0].mxu0 }
 0x21b   :  { %1802 = vst [vmem:[%s3613_s3] sm:$0x7] %v1308_v52  ;;  %v1855_v63 = vpop.f32.mrb[1].mxu0 }
 0x21c   :  { %v1378_v8 = vpop.f32.mrb[0].mxu1 }
 0x21d   :  { %1803 = vst [vmem:[%s3613_s3 + $0x4] sm:$0x7] %v1378_v8  ;;  %v1862_v55 = vpop.f32.mrb[1].mxu1 }
 0x23e   :  { %v1448_v59 = vpop.f32.mrb[2].mxu0 }
 0x23f   :  { %1804 = vst [vmem:[%s3613_s3 + $0x8] sm:$0x7] %v1448_v59  ;;  %v1869_v11 = vpop.f32.mrb[3].mxu0 }
 0x240   :  { %v1518_v6 = vpop.f32.mrb[2].mxu1 }
 0x241   :  { %1805 = vst [vmem:[%s3613_s3 + $0xc] sm:$0x7] %v1518_v6  ;;  %v1876_v35 = vpop.f32.mrb[3].mxu1 }
 0x262   :  { %v1588_v5 = vpop.f32.mrb[4].mxu0 }
 0x263   :  { %1806 = vst [vmem:[%s3613_s3 + $0x10] sm:$0x7] %v1588_v5  ;;  %v1883_v20 = vpop.f32.mrb[5].mxu0 }
 0x264   :  { %v1658_v16 = vpop.f32.mrb[4].mxu1 }
 0x265   :  { %1807 = vst [vmem:[%s3613_s3 + $0x14] sm:$0x7] %v1658_v16  ;;  %v1890_v26 = vpop.f32.mrb[5].mxu1 }
 0x278   :  { %v1728_v39 = vpop.f32.mrb[6].mxu0 }
 0x279   :  { %1808 = vst [vmem:[%s3613_s3 + $0x18] sm:$0x7] %v1728_v39  ;;  %v1897_v0 = vpop.f32.mrb[7].mxu0 }
 0x27a   :  { %v1798_v13 = vpop.f32.mrb[6].mxu1 }
 0x27b   :  { %1809 = vst [vmem:[%s3613_s3 + $0x1c] sm:$0x7] %v1798_v13  ;;  %v1904_v41 = vpop.f32.mrb[7].mxu1 }
 0x27c   :  { %1814 = vsyncpa [#allocation3], 1 }
 0x27d   :  { %1815 = vsyncpa [#allocation5], 1 }

</bundles_post_ra>
